<compile_context>
chip_gen: v6e
topology: v6e:2x2x1
jax: 0.10.0
libtpu: 0.0.40
codegen_flags: <defaults>
</compile_context>

<pallas_src>
import functools

import jax
import jax.numpy as jnp
from jax.experimental import pallas as pl
from jax.experimental.pallas import tpu as pltpu


def _context_attention_kernel(scal_ref, xq_ref, xs_ref, wq_ref, bq_ref,
                              wk_ref, bk_ref, wv_ref, bv_ref, wo_ref, bo_ref,
                              out_ref, k_sc, v_sc,
                              *, alpha, inv_scale, half_window, tq):
    """One (batch, query-block) grid step.

    scal_ref: (2,)   f32 SMEM  -> [gamma, theta]
    xq_ref:   (TQ, F) this query tile's activations (matmul dtype)
    xs_ref:   (S, F)  full-sequence activations (matmul dtype), used at qi == 0
    k_sc/v_sc:(S, E)  VMEM scratch: this batch element's K / V (matmul dtype)
    out_ref:  (TQ, F) f32
    """
    f32 = jnp.float32

    def mm(a, b, contract_b_last=False):
        dims = (((1,), (1,) if contract_b_last else (0,)), ((), ()))
        return jax.lax.dot_general(a, b, dimension_numbers=dims,
                                   preferred_element_type=f32)

    # ---- K / V projections: once per batch element, reused across q-tiles. ----
    @pl.when(pl.program_id(1) == 0)
    def _():
        xs = xs_ref[...]                                              # (S, F)
        k_sc[...] = (mm(xs, wk_ref[...]) + bk_ref[...]).astype(k_sc.dtype)
        v_sc[...] = (mm(xs, wv_ref[...]) + bv_ref[...]).astype(v_sc.dtype)

    # ---- Q projection for this tile; 1/sqrt(E) folded into q ((TQ,E) mul). ----
    q = (mm(xq_ref[...], wq_ref[...]) + bq_ref[...]) * inv_scale      # (TQ, E) f32

    # ---- Scores: (q / scale) @ K^T  (bf16/f32 MXU operands, f32 accumulation). ----
    scores = mm(q.astype(k_sc.dtype), k_sc[...], contract_b_last=True)  # (TQ, S)

    # ---- Positional encoding + window mask built in-kernel from iota
    #      (no B*S^2 pe/mask tensors streamed from HBM). ----
    row0 = pl.program_id(1) * tq
    row_ids = row0 + jax.lax.broadcasted_iota(jnp.int32, scores.shape, 0)
    col_ids = jax.lax.broadcasted_iota(jnp.int32, scores.shape, 1)
    diff = row_ids - col_ids
    gamma = scal_ref[0]
    theta = scal_ref[1]
    pos2 = diff.astype(f32) ** 2
    scores = scores + jnp.exp(-jnp.abs(gamma * pos2 - theta))          # (TQ, S)

    keep = jnp.abs(diff) <= half_window                               # (TQ, S) bool

    # ---- Two softmaxes over the same score tile. The masked branch uses its
    #      OWN row max so it stays finite even when out-of-window logits
    #      dominate; masked entries contribute exactly zero weight, matching
    #      the reference's -1e9 fill (which underflows to 0 after exp). ----
    m1 = jnp.max(scores, axis=-1, keepdims=True)
    e1 = jnp.exp(scores - m1)
    s2 = jnp.where(keep, scores, jnp.float32(-1e9))
    m2 = jnp.max(s2, axis=-1, keepdims=True)
    e2 = jnp.exp(s2 - m2)
    inv_l1 = pl.reciprocal(jnp.sum(e1, axis=-1, keepdims=True), approx=True)
    inv_l2 = pl.reciprocal(jnp.sum(e2, axis=-1, keepdims=True), approx=True)

    # Blend the probabilities BEFORE a single attn @ V matmul.
    a_blend = (alpha * inv_l1) * e1 + ((1.0 - alpha) * inv_l2) * e2    # (TQ, S)

    o = mm(a_blend.astype(v_sc.dtype), v_sc[...])                      # (TQ, E)
    out_ref[...] = (mm(o.astype(wo_ref.dtype), wo_ref[...])
                    + bo_ref[...]).astype(out_ref.dtype)


def context_attention(x, params, *, attention_window, alpha=0.5, tq=None,
                      matmul_dtype=jnp.bfloat16):
    """Forward pass of ContextAttention (num_heads=1).

    matmul_dtype: dtype of the MXU operands (x, weights, K/V scratch,
    probabilities). Default bf16 (native MXU dtype on v5e/v6e/v7x);
    accumulation is always f32. Pass matmul_dtype=None for exact-f32 matmuls.
    """
    B, S, F = x.shape
    E = params["wq"].shape[1]

    if tq is None:
        tq = min(256, S)        # v5e/v6e sweet spot; see v7x TODO at top of file
    tq = min(tq, S)
    assert S % tq == 0, "sequence length must be divisible by the query tile"
    assert tq % 8 == 0 or tq == S, "query tile must be sublane-aligned"
    num_q_blocks = S // tq

    mdt = jnp.float32 if matmul_dtype is None else matmul_dtype
    # MXU operands pre-cast ONCE here (halves weight/x HBM DMA + VMEM in bf16
    # mode) instead of per grid step inside the kernel. Biases stay f32 and are
    # added to the f32 MXU accumulation.
    xc = x.astype(mdt)
    wq = params["wq"].astype(mdt)
    wk = params["wk"].astype(mdt)
    wv = params["wv"].astype(mdt)
    wo = params["wo"].astype(mdt)
    bq = params["bq"].astype(jnp.float32)
    bk = params["bk"].astype(jnp.float32)
    bv = params["bv"].astype(jnp.float32)
    bo = params["bo"].astype(jnp.float32)
    # gamma/theta are runtime parameters -> tiny (2,) f32 SMEM operand (the
    # positional encoding is rebuilt in-kernel from iota each tile).
    scal = jnp.stack([params["gamma"].astype(jnp.float32),
                      params["theta"].astype(jnp.float32)])

    kernel = functools.partial(
        _context_attention_kernel,
        alpha=float(alpha),
        inv_scale=1.0 / (float(E) ** 0.5),
        half_window=int(attention_window // 2),
        tq=tq)

    # Explicit scoped-VMEM budget: double-buffered operands + K/V scratch +
    # ~8 live (tq, S) f32 temporaries, with 2x headroom for compiler scratch.
    ms = jnp.dtype(mdt).itemsize
    est = (2 * tq * F * ms              # xq tile (double-buffered)
           + 2 * S * F * ms             # full-seq x (double-buffered)
           + 2 * 4 * F * E * ms         # wq/wk/wv/wo (double-buffered)
           + 2 * (3 * E + F) * 4        # biases (f32)
           + 2 * tq * F * 4             # output tile (double-buffered)
           + 2 * S * E * ms             # K/V scratch
           + 8 * tq * S * 4             # score-sized temporaries
           + 4 * tq * E * 4)            # q / o temporaries
    vmem_limit = int(max(16 << 20, min(2 * est + (4 << 20), 128 << 20)))

    grid_spec = pltpu.PrefetchScalarGridSpec(
        num_scalar_prefetch=0,
        grid=(B, num_q_blocks),
        in_specs=[
            pl.BlockSpec(memory_space=pltpu.MemorySpace.SMEM),               # [gamma, theta]
            pl.BlockSpec((pl.Squeezed(), tq, F), lambda b, qi: (b, qi, 0)),  # x (q tile)
            pl.BlockSpec((pl.Squeezed(), S, F), lambda b, qi: (b, 0, 0)),    # x (full seq, K/V)
            pl.BlockSpec((F, E), lambda b, qi: (0, 0)),                      # wq
            pl.BlockSpec((1, E), lambda b, qi: (0, 0)),                      # bq
            pl.BlockSpec((F, E), lambda b, qi: (0, 0)),                      # wk
            pl.BlockSpec((1, E), lambda b, qi: (0, 0)),                      # bk
            pl.BlockSpec((F, E), lambda b, qi: (0, 0)),                      # wv
            pl.BlockSpec((1, E), lambda b, qi: (0, 0)),                      # bv
            pl.BlockSpec((E, F), lambda b, qi: (0, 0)),                      # wo
            pl.BlockSpec((1, F), lambda b, qi: (0, 0)),                      # bo
        ],
        out_specs=pl.BlockSpec((pl.Squeezed(), tq, F), lambda b, qi: (b, qi, 0)),
        scratch_shapes=[
            pltpu.VMEM((S, E), mdt),   # K for the current batch element
            pltpu.VMEM((S, E), mdt),   # V for the current batch element
        ],
    )

    # Batch axis is megacore-parallel; the query-block axis stays "arbitrary"
    # because K/V are built once per batch element (qi == 0) and reused from
    # scratch across the remaining query tiles.
    return pl.pallas_call(
        kernel,
        grid_spec=grid_spec,
        out_shape=jax.ShapeDtypeStruct((B, S, F), jnp.float32),
        compiler_params=pltpu.CompilerParams(
            dimension_semantics=("parallel", "arbitrary"),
            vmem_limit_bytes=vmem_limit),
    )(scal, xc, xc, wq, bq, wk, bk, wv, bv, wo, bo)


def _reference(x, params, *, attention_window, alpha=0.5):
    """Pure-JAX reference mirroring the PyTorch forward (num_heads=1)."""
    B, S, F = x.shape
    E = params["wq"].shape[1]
    scale = float(E) ** 0.5
    idx = jnp.arange(S, dtype=jnp.float32)
    diff = idx[:, None] - idx[None, :]
    pos_info = diff ** 2
    mask = jnp.abs(diff) > float(attention_window // 2)

    q = x @ params["wq"] + params["bq"]
    k = x @ params["wk"] + params["bk"]
    v = x @ params["wv"] + params["bv"]
    pe = jnp.exp(-jnp.abs(params["gamma"] * pos_info - params["theta"]))
    s1 = jnp.einsum("bqe,bke->bqk", q, k) / scale + pe
    s2 = jnp.where(mask, -1e9, s1)
    a1 = jax.nn.softmax(s1, axis=-1)
    a2 = jax.nn.softmax(s2, axis=-1)
    o = alpha * (a1 @ v) + (1 - alpha) * (a2 @ v)
    return o @ params["wo"] + params["bo"]


def _init_params(key, in_features, embedding_features):
    ks = jax.random.split(key, 8)
    s_in = 1.0 / (in_features ** 0.5)
    s_emb = 1.0 / (embedding_features ** 0.5)
    return {
        "wq": jax.random.uniform(ks[0], (in_features, embedding_features), jnp.float32, -s_in, s_in),
        "bq": jax.random.uniform(ks[1], (1, embedding_features), jnp.float32, -s_in, s_in),
        "wk": jax.random.uniform(ks[2], (in_features, embedding_features), jnp.float32, -s_in, s_in),
        "bk": jax.random.uniform(ks[3], (1, embedding_features), jnp.float32, -s_in, s_in),
        "wv": jax.random.uniform(ks[4], (in_features, embedding_features), jnp.float32, -s_in, s_in),
        "bv": jax.random.uniform(ks[5], (1, embedding_features), jnp.float32, -s_in, s_in),
        "wo": jax.random.uniform(ks[6], (embedding_features, in_features), jnp.float32, -s_emb, s_emb),
        "bo": jax.random.uniform(ks[7], (1, in_features), jnp.float32, -s_emb, s_emb),
        "gamma": jnp.array(1.0, jnp.float32),   # nn.Parameter(torch.tensor(1.0))
        "theta": jnp.array(0.0, jnp.float32),   # nn.Parameter(torch.tensor(0.0))
    }


if __name__ == "__main__":
    # Lane-dense small demo: F = E = 128 (multiple of 128), S tiled by tq=32
    # (exercises the qi > 0 K/V-scratch reuse path).
    B, S, F, E = 2, 64, 128, 128
    attention_window = 16
    alpha = 0.5

    key = jax.random.PRNGKey(0)
    k_x, k_p = jax.random.split(key)
    x = jax.random.normal(k_x, (B, S, F), jnp.float32)
    params = _init_params(k_p, F, E)

    # Default path: bf16 MXU operands, f32 accumulation.
    out_bf16 = context_attention(x, params, attention_window=attention_window,
                                 alpha=alpha, tq=32)
    out_bf16 = jax.block_until_ready(out_bf16)

    # Opt-in exact-f32 matmul path.
    out_f32 = context_attention(x, params, attention_window=attention_window,
                                alpha=alpha, tq=32, matmul_dtype=None)
    out_f32 = jax.block_until_ready(out_f32)

    ref = _reference(x, params, attention_window=attention_window, alpha=alpha)
    assert out_bf16.shape == (B, S, F)
    # bf16 operands introduce ~1e-3..1e-2-level error on projections/scores.
    assert jnp.allclose(out_bf16, ref, atol=5e-2, rtol=5e-2), "bf16 path mismatch vs reference"
    # f32 path differs from the reference only by the approx softmax reciprocals (~1e-4).
    assert jnp.allclose(out_f32, ref, atol=2e-3, rtol=2e-3), "f32 path mismatch vs reference"

    print("KERNEL_OK")
</pallas_src>

<mosaic_0001>
module attributes {stable_mosaic.version = 11 : i64} {
  func.func @_context_attention_kernel(%arg0: i32, %arg1: i32, %arg2: memref<2xf32, #tpu.memory_space<smem>>, %arg3: memref<1x32x128xbf16, #tpu.memory_space<vmem>>, %arg4: memref<1x64x128xbf16, #tpu.memory_space<vmem>>, %arg5: memref<128x128xbf16, #tpu.memory_space<vmem>>, %arg6: memref<1x128xf32, #tpu.memory_space<vmem>>, %arg7: memref<128x128xbf16, #tpu.memory_space<vmem>>, %arg8: memref<1x128xf32, #tpu.memory_space<vmem>>, %arg9: memref<128x128xbf16, #tpu.memory_space<vmem>>, %arg10: memref<1x128xf32, #tpu.memory_space<vmem>>, %arg11: memref<128x128xbf16, #tpu.memory_space<vmem>>, %arg12: memref<1x128xf32, #tpu.memory_space<vmem>>, %arg13: memref<1x32x128xf32, #tpu.memory_space<vmem>>, %arg14: memref<64x128xbf16, #tpu.memory_space<vmem>>, %arg15: memref<64x128xbf16, #tpu.memory_space<vmem>>) attributes {dimension_semantics = [#tpu.dimension_semantics<parallel>, #tpu.dimension_semantics<arbitrary>], iteration_bounds = array<i64: 2, 2>, scalar_prefetch = 0 : i64, scratch_operands = 2 : i64, tpu.core_type = #tpu.core_type<tc>, window_params = [{transform_indices = @transform_0, window_bounds = array<i64: 2>}, {transform_indices = @transform_1, window_bounds = array<i64: 1, 32, 128>}, {transform_indices = @transform_2, window_bounds = array<i64: 1, 64, 128>}, {pipeline_mode = #tpu.pipeline_mode<synchronous>, transform_indices = @transform_3, window_bounds = array<i64: 128, 128>}, {pipeline_mode = #tpu.pipeline_mode<synchronous>, transform_indices = @transform_4, window_bounds = array<i64: 1, 128>}, {pipeline_mode = #tpu.pipeline_mode<synchronous>, transform_indices = @transform_5, window_bounds = array<i64: 128, 128>}, {pipeline_mode = #tpu.pipeline_mode<synchronous>, transform_indices = @transform_6, window_bounds = array<i64: 1, 128>}, {pipeline_mode = #tpu.pipeline_mode<synchronous>, transform_indices = @transform_7, window_bounds = array<i64: 128, 128>}, {pipeline_mode = #tpu.pipeline_mode<synchronous>, transform_indices = @transform_8, window_bounds = array<i64: 1, 128>}, {pipeline_mode = #tpu.pipeline_mode<synchronous>, transform_indices = @transform_9, window_bounds = array<i64: 128, 128>}, {pipeline_mode = #tpu.pipeline_mode<synchronous>, transform_indices = @transform_10, window_bounds = array<i64: 1, 128>}, {transform_indices = @transform_11, window_bounds = array<i64: 1, 32, 128>}]} {
    %c0_i32 = arith.constant 0 : i32
    %0 = arith.cmpi eq, %arg1, %c0_i32 : i32
    %1 = arith.extui %0 : i1 to i32
    %c0_i32_0 = arith.constant 0 : i32
    %2 = arith.cmpi ne, %1, %c0_i32_0 : i32
    scf.if %2 {
      %c0_31 = arith.constant 0 : index
      %c0_32 = arith.constant 0 : index
      %c0_33 = arith.constant 0 : index
      %76 = vector.load %arg4[%c0_31, %c0_32, %c0_33] : memref<1x64x128xbf16, #tpu.memory_space<vmem>>, vector<1x64x128xbf16>
      %77 = vector.shape_cast %76 : vector<1x64x128xbf16> to vector<64x128xbf16>
      %c0_34 = arith.constant 0 : index
      %c0_35 = arith.constant 0 : index
      %78 = vector.load %arg7[%c0_34, %c0_35] : memref<128x128xbf16, #tpu.memory_space<vmem>>, vector<128x128xbf16>
      %cst_36 = arith.constant dense<0.000000e+00> : vector<64x128xf32>
      %79 = tpu.matmul %77, %78, %cst_36 {dimension_numbers = #tpu.dot_dimension_numbers<[1], [0], [0], [1], [0, 0, 1, 1], [], []>} : vector<64x128xbf16>, vector<128x128xbf16>, vector<64x128xf32> -> vector<64x128xf32>
      %c0_37 = arith.constant 0 : index
      %c0_38 = arith.constant 0 : index
      %80 = vector.load %arg8[%c0_37, %c0_38] : memref<1x128xf32, #tpu.memory_space<vmem>>, vector<1x128xf32>
      %81 = vector.broadcast %80 : vector<1x128xf32> to vector<64x128xf32>
      %82 = arith.addf %79, %81 : vector<64x128xf32>
      %83 = arith.truncf %82 : vector<64x128xf32> to vector<64x128xbf16>
      %c0_39 = arith.constant 0 : index
      %c0_40 = arith.constant 0 : index
      %84 = vector.load %arg14[%c0_39, %c0_40] : memref<64x128xbf16, #tpu.memory_space<vmem>>, vector<64x128xbf16>
      tpu.vector_store %arg14[%c0_39, %c0_40], %83 {strides = array<i32>} : memref<64x128xbf16, #tpu.memory_space<vmem>>, vector<64x128xbf16>,
      %c0_41 = arith.constant 0 : index
      %c0_42 = arith.constant 0 : index
      %85 = vector.load %arg9[%c0_41, %c0_42] : memref<128x128xbf16, #tpu.memory_space<vmem>>, vector<128x128xbf16>
      %cst_43 = arith.constant dense<0.000000e+00> : vector<64x128xf32>
      %86 = tpu.matmul %77, %85, %cst_43 {dimension_numbers = #tpu.dot_dimension_numbers<[1], [0], [0], [1], [0, 0, 1, 1], [], []>} : vector<64x128xbf16>, vector<128x128xbf16>, vector<64x128xf32> -> vector<64x128xf32>
      %c0_44 = arith.constant 0 : index
      %c0_45 = arith.constant 0 : index
      %87 = vector.load %arg10[%c0_44, %c0_45] : memref<1x128xf32, #tpu.memory_space<vmem>>, vector<1x128xf32>
      %88 = vector.broadcast %87 : vector<1x128xf32> to vector<64x128xf32>
      %89 = arith.addf %86, %88 : vector<64x128xf32>
      %90 = arith.truncf %89 : vector<64x128xf32> to vector<64x128xbf16>
      %c0_46 = arith.constant 0 : index
      %c0_47 = arith.constant 0 : index
      %91 = vector.load %arg15[%c0_46, %c0_47] : memref<64x128xbf16, #tpu.memory_space<vmem>>, vector<64x128xbf16>
      tpu.vector_store %arg15[%c0_46, %c0_47], %90 {strides = array<i32>} : memref<64x128xbf16, #tpu.memory_space<vmem>>, vector<64x128xbf16>,
    } else {
    }
    %c0 = arith.constant 0 : index
    %c0_1 = arith.constant 0 : index
    %c0_2 = arith.constant 0 : index
    %3 = vector.load %arg3[%c0, %c0_1, %c0_2] : memref<1x32x128xbf16, #tpu.memory_space<vmem>>, vector<1x32x128xbf16>
    %4 = vector.shape_cast %3 : vector<1x32x128xbf16> to vector<32x128xbf16>
    %c0_3 = arith.constant 0 : index
    %c0_4 = arith.constant 0 : index
    %5 = vector.load %arg5[%c0_3, %c0_4] : memref<128x128xbf16, #tpu.memory_space<vmem>>, vector<128x128xbf16>
    %cst = arith.constant dense<0.000000e+00> : vector<32x128xf32>
    %6 = tpu.matmul %4, %5, %cst {dimension_numbers = #tpu.dot_dimension_numbers<[1], [0], [0], [1], [0, 0, 1, 1], [], []>} : vector<32x128xbf16>, vector<128x128xbf16>, vector<32x128xf32> -> vector<32x128xf32>
    %c0_5 = arith.constant 0 : index
    %c0_6 = arith.constant 0 : index
    %7 = vector.load %arg6[%c0_5, %c0_6] : memref<1x128xf32, #tpu.memory_space<vmem>>, vector<1x128xf32>
    %8 = vector.broadcast %7 : vector<1x128xf32> to vector<32x128xf32>
    %9 = arith.addf %6, %8 : vector<32x128xf32>
    %cst_7 = arith.constant 0.0883883461 : f32
    %10 = vector.broadcast %cst_7 : f32 to vector<32x128xf32>
    %11 = arith.mulf %9, %10 : vector<32x128xf32>
    %12 = arith.truncf %11 : vector<32x128xf32> to vector<32x128xbf16>
    %c0_8 = arith.constant 0 : index
    %c0_9 = arith.constant 0 : index
    %13 = vector.load %arg14[%c0_8, %c0_9] : memref<64x128xbf16, #tpu.memory_space<vmem>>, vector<64x128xbf16>
    %cst_10 = arith.constant dense<0.000000e+00> : vector<32x64xf32>
    %14 = tpu.matmul %12, %13, %cst_10 {dimension_numbers = #tpu.dot_dimension_numbers<[1], [1], [0], [0], [0, 0, 1, 0], [], []>} : vector<32x128xbf16>, vector<64x128xbf16>, vector<32x64xf32> -> vector<32x64xf32>
    %c32_i32 = arith.constant 32 : i32
    %15 = arith.muli %arg1, %c32_i32 : i32
    %16 = tpu.iota {dimensions = array<i32: 0>} : vector<32x64xi32>
    %17 = vector.broadcast %15 : i32 to vector<32x64xi32>
    %18 = arith.addi %17, %16 : vector<32x64xi32>
    %19 = tpu.iota {dimensions = array<i32: 1>} : vector<32x64xi32>
    %20 = arith.subi %18, %19 : vector<32x64xi32>
    %c0_11 = arith.constant 0 : index
    %21 = memref.load %arg2[%c0_11] : memref<2xf32, #tpu.memory_space<smem>>
    %c1 = arith.constant 1 : index
    %22 = memref.load %arg2[%c1] : memref<2xf32, #tpu.memory_space<smem>>
    %23 = arith.sitofp %20 : vector<32x64xi32> to vector<32x64xf32>
    %24 = arith.mulf %23, %23 : vector<32x64xf32>
    %25 = vector.broadcast %21 : f32 to vector<32x64xf32>
    %26 = arith.mulf %25, %24 : vector<32x64xf32>
    %27 = vector.broadcast %22 : f32 to vector<32x64xf32>
    %28 = arith.subf %26, %27 : vector<32x64xf32>
    %29 = math.absf %28 : vector<32x64xf32>
    %cst_12 = arith.constant 0.000000e+00 : f32
    %30 = vector.broadcast %cst_12 : f32 to vector<32x64xf32>
    %31 = arith.subf %30, %29 : vector<32x64xf32>
    %32 = math.exp %31 : vector<32x64xf32>
    %33 = arith.addf %14, %32 : vector<32x64xf32>
    %34 = math.absi %20 : vector<32x64xi32>
    %c8_i32 = arith.constant 8 : i32
    %35 = vector.broadcast %c8_i32 : i32 to vector<32x64xi32>
    %36 = arith.cmpi sle, %34, %35 : vector<32x64xi32>
    %cst_13 = arith.constant dense<0xFF800000> : vector<32xf32>
    %37 = vector.multi_reduction <maximumf>, %33, %cst_13 [1] : vector<32x64xf32> to vector<32xf32>
    %38 = vector.shape_cast %37 : vector<32xf32> to vector<32x1xf32>
    %39 = vector.broadcast %38 : vector<32x1xf32> to vector<32x64xf32>
    %40 = arith.subf %33, %39 : vector<32x64xf32>
    %41 = math.exp %40 : vector<32x64xf32>
    %cst_14 = arith.constant -1.000000e+09 : f32
    %42 = vector.broadcast %cst_14 : f32 to vector<32x64xf32>
    %43 = arith.select %36, %33, %42 : vector<32x64xi1>, vector<32x64xf32>
    %cst_15 = arith.constant dense<0xFF800000> : vector<32xf32>
    %44 = vector.multi_reduction <maximumf>, %43, %cst_15 [1] : vector<32x64xf32> to vector<32xf32>
    %45 = vector.shape_cast %44 : vector<32xf32> to vector<32x1xf32>
    %46 = vector.broadcast %45 : vector<32x1xf32> to vector<32x64xf32>
    %47 = arith.subf %43, %46 : vector<32x64xf32>
    %48 = math.exp %47 : vector<32x64xf32>
    %cst_16 = arith.constant dense<0.000000e+00> : vector<32xf32>
    %49 = vector.multi_reduction <add>, %41, %cst_16 [1] : vector<32x64xf32> to vector<32xf32>
    %50 = vector.shape_cast %49 : vector<32xf32> to vector<32x1xf32>
    %51 = tpu.reciprocal %50 {approx = true} : vector<32x1xf32> -> vector<32x1xf32>
    %cst_17 = arith.constant dense<0.000000e+00> : vector<32xf32>
    %52 = vector.multi_reduction <add>, %48, %cst_17 [1] : vector<32x64xf32> to vector<32xf32>
    %53 = vector.shape_cast %52 : vector<32xf32> to vector<32x1xf32>
    %54 = tpu.reciprocal %53 {approx = true} : vector<32x1xf32> -> vector<32x1xf32>
    %cst_18 = arith.constant 5.000000e-01 : f32
    %55 = vector.broadcast %cst_18 : f32 to vector<32x1xf32>
    %56 = arith.mulf %55, %51 : vector<32x1xf32>
    %57 = vector.broadcast %56 : vector<32x1xf32> to vector<32x64xf32>
    %58 = arith.mulf %57, %41 : vector<32x64xf32>
    %cst_19 = arith.constant 5.000000e-01 : f32
    %59 = vector.broadcast %cst_19 : f32 to vector<32x1xf32>
    %60 = arith.mulf %59, %54 : vector<32x1xf32>
    %61 = vector.broadcast %60 : vector<32x1xf32> to vector<32x64xf32>
    %62 = arith.mulf %61, %48 : vector<32x64xf32>
    %63 = arith.addf %58, %62 : vector<32x64xf32>
    %64 = arith.truncf %63 : vector<32x64xf32> to vector<32x64xbf16>
    %c0_20 = arith.constant 0 : index
    %c0_21 = arith.constant 0 : index
    %65 = vector.load %arg15[%c0_20, %c0_21] : memref<64x128xbf16, #tpu.memory_space<vmem>>, vector<64x128xbf16>
    %cst_22 = arith.constant dense<0.000000e+00> : vector<32x128xf32>
    %66 = tpu.matmul %64, %65, %cst_22 {dimension_numbers = #tpu.dot_dimension_numbers<[1], [0], [0], [1], [0, 0, 1, 1], [], []>} : vector<32x64xbf16>, vector<64x128xbf16>, vector<32x128xf32> -> vector<32x128xf32>
    %67 = arith.truncf %66 : vector<32x128xf32> to vector<32x128xbf16>
    %c0_23 = arith.constant 0 : index
    %c0_24 = arith.constant 0 : index
    %68 = vector.load %arg11[%c0_23, %c0_24] : memref<128x128xbf16, #tpu.memory_space<vmem>>, vector<128x128xbf16>
    %cst_25 = arith.constant dense<0.000000e+00> : vector<32x128xf32>
    %69 = tpu.matmul %67, %68, %cst_25 {dimension_numbers = #tpu.dot_dimension_numbers<[1], [0], [0], [1], [0, 0, 1, 1], [], []>} : vector<32x128xbf16>, vector<128x128xbf16>, vector<32x128xf32> -> vector<32x128xf32>
    %c0_26 = arith.constant 0 : index
    %c0_27 = arith.constant 0 : index
    %70 = vector.load %arg12[%c0_26, %c0_27] : memref<1x128xf32, #tpu.memory_space<vmem>>, vector<1x128xf32>
    %71 = vector.broadcast %70 : vector<1x128xf32> to vector<32x128xf32>
    %72 = arith.addf %69, %71 : vector<32x128xf32>
    %c0_28 = arith.constant 0 : index
    %c0_29 = arith.constant 0 : index
    %c0_30 = arith.constant 0 : index
    %73 = vector.load %arg13[%c0_28, %c0_29, %c0_30] : memref<1x32x128xf32, #tpu.memory_space<vmem>>, vector<1x32x128xf32>
    %74 = vector.shape_cast %73 : vector<1x32x128xf32> to vector<32x128xf32>
    %75 = vector.shape_cast %72 : vector<32x128xf32> to vector<1x32x128xf32>
    tpu.vector_store %arg13[%c0_28, %c0_29, %c0_30], %75 {strides = array<i32>} : memref<1x32x128xf32, #tpu.memory_space<vmem>>, vector<1x32x128xf32>,
    return
  }
  func.func @transform_0(%arg0: i32, %arg1: i32) -> i32 {
    %c0_i32 = arith.constant 0 : i32
    %c0_i32_0 = arith.constant 0 : i32
    return %c0_i32 : i32
  }
  func.func @transform_1(%arg0: i32, %arg1: i32) -> (i32, i32, i32) {
    %c0_i32 = arith.constant 0 : i32
    %c0_i32_0 = arith.constant 0 : i32
    return %arg0, %arg1, %c0_i32 : i32, i32, i32
  }
  func.func @transform_2(%arg0: i32, %arg1: i32) -> (i32, i32, i32) {
    %c0_i32 = arith.constant 0 : i32
    %c0_i32_0 = arith.constant 0 : i32
    %c0_i32_1 = arith.constant 0 : i32
    return %arg0, %c0_i32, %c0_i32_0 : i32, i32, i32
  }
  func.func @transform_3(%arg0: i32, %arg1: i32) -> (i32, i32) {
    %c0_i32 = arith.constant 0 : i32
    %c0_i32_0 = arith.constant 0 : i32
    %c0_i32_1 = arith.constant 0 : i32
    return %c0_i32, %c0_i32_0 : i32, i32
  }
  func.func @transform_4(%arg0: i32, %arg1: i32) -> (i32, i32) {
    %c0_i32 = arith.constant 0 : i32
    %c0_i32_0 = arith.constant 0 : i32
    %c0_i32_1 = arith.constant 0 : i32
    return %c0_i32, %c0_i32_0 : i32, i32
  }
  func.func @transform_5(%arg0: i32, %arg1: i32) -> (i32, i32) {
    %c0_i32 = arith.constant 0 : i32
    %c0_i32_0 = arith.constant 0 : i32
    %c0_i32_1 = arith.constant 0 : i32
    return %c0_i32, %c0_i32_0 : i32, i32
  }
  func.func @transform_6(%arg0: i32, %arg1: i32) -> (i32, i32) {
    %c0_i32 = arith.constant 0 : i32
    %c0_i32_0 = arith.constant 0 : i32
    %c0_i32_1 = arith.constant 0 : i32
    return %c0_i32, %c0_i32_0 : i32, i32
  }
  func.func @transform_7(%arg0: i32, %arg1: i32) -> (i32, i32) {
    %c0_i32 = arith.constant 0 : i32
    %c0_i32_0 = arith.constant 0 : i32
    %c0_i32_1 = arith.constant 0 : i32
    return %c0_i32, %c0_i32_0 : i32, i32
  }
  func.func @transform_8(%arg0: i32, %arg1: i32) -> (i32, i32) {
    %c0_i32 = arith.constant 0 : i32
    %c0_i32_0 = arith.constant 0 : i32
    %c0_i32_1 = arith.constant 0 : i32
    return %c0_i32, %c0_i32_0 : i32, i32
  }
  func.func @transform_9(%arg0: i32, %arg1: i32) -> (i32, i32) {
    %c0_i32 = arith.constant 0 : i32
    %c0_i32_0 = arith.constant 0 : i32
    %c0_i32_1 = arith.constant 0 : i32
    return %c0_i32, %c0_i32_0 : i32, i32
  }
  func.func @transform_10(%arg0: i32, %arg1: i32) -> (i32, i32) {
    %c0_i32 = arith.constant 0 : i32
    %c0_i32_0 = arith.constant 0 : i32
    %c0_i32_1 = arith.constant 0 : i32
    return %c0_i32, %c0_i32_0 : i32, i32
  }
  func.func @transform_11(%arg0: i32, %arg1: i32) -> (i32, i32, i32) {
    %c0_i32 = arith.constant 0 : i32
    %c0_i32_0 = arith.constant 0 : i32
    return %arg0, %arg1, %c0_i32 : i32, i32, i32
  }
}

</mosaic_0001>

<bundles_post_ra>
// kernel: tpu_custom_call.1
= control target key start
LH: loop header
LB: loop body
LE: loop exit
PB: predicated region body
PF: predicated region fallthrough
CT: control target
= control target key end

     0   :  { %s3103_s0 = inlined_call_operand.hbm [shape: f32[2], index: 0, kind: input, shape index: {}]   ;;  %s3104_s1 = inlined_call_operand.hbm [shape: bf16[2,64,128], index: 1, kind: input, shape index: {}]   ;;  %s3105_s2 = inlined_call_operand.hbm [shape: bf16[2,64,128], index: 2, kind: input, shape index: {}]   ;;  %s3106_s3 = inlined_call_operand.hbm [shape: bf16[128,128], index: 3, kind: input, shape index: {}]   ;;  %s3107_s4 = inlined_call_operand.vmem [shape: f32[1,128], index: 4, kind: input, shape index: {}]   ;;  %s3108_s5 = inlined_call_operand.hbm [shape: bf16[128,128], index: 5, kind: input, shape index: {}]   ;;  %s3109_s6 = inlined_call_operand.vmem [shape: f32[1,128], index: 6, kind: input, shape index: {}]   ;;  %s3110_s7 = inlined_call_operand.hbm [shape: bf16[128,128], index: 7, kind: input, shape index: {}]   ;;  %s3111_s8 = inlined_call_operand.vmem [shape: f32[1,128], index: 8, kind: input, shape index: {}]   ;;  %s3112_s9 = inlined_call_operand.hbm [shape: bf16[128,128], index: 9, kind: input, shape index: {}]   ;;  %s3113_s10 = inlined_call_operand.vmem [shape: f32[1,128], index: 10, kind: input, shape index: {}]   ;;  %s3114_s11 = inlined_call_operand.hbm [shape: f32[2,64,128], index: 11, kind: output, shape index: {}]  }
   0x1   :  { %3128 = sst [smem:[#allocation31_spill]] %s3103_s0 }
   0x2   :  { %3129 = sst [smem:[#allocation32_spill]] %s3106_s3 }
   0x3   :  { %3130 = sst [smem:[#allocation33_spill]] %s3107_s4 }
   0x4   :  { %3131 = sst [smem:[#allocation34_spill]] %s3108_s5 }
   0x5   :  { %3132 = sst [smem:[#allocation35_spill]] %s3109_s6 }
   0x6   :  { %3133 = sst [smem:[#allocation36_spill]] %s3110_s7 }
   0x7   :  { %3134 = sst [smem:[#allocation37_spill]] %s3111_s8 }
   0x8   :  { %3135 = sst [smem:[#allocation38_spill]] %s3112_s9 }
   0x9   :  { %3136 = sst [smem:[#allocation39_spill]] %s3113_s10 }
   0xa   :  { %3137 = sst [smem:[#allocation40_spill]] %s3114_s11 }
   0xb   :  { %16 = vsyncpa [#allocation7], 0 }
   0xc   :  { %17 = vsyncpa [#allocation5], 0 }
   0xd   :  { %19 = vsyncpa [#allocation5 + $0x1], 0 }
   0xe   :  { %20 = vsyncpa [#allocation10], 0 }
   0xf   :  { %22 = vsyncpa [#allocation10 + $0x1], 0 }
  0x10   :  { %23 = vsyncpa [#allocation13], 0 }
  0x11   :  { %24 = vsyncpa [#allocation16], 0 }
  0x12   :  { %25 = vsyncpa [#allocation6], 0 }
  0x13   :  { %27 = vsyncpa [#allocation6 + $0x1], 0  ;;  %s2685_s17 = smov 0   ;;  %s2687_s18 = smov 0  }
  0x14   :  { %s2689_s19 = smov 0   ;;  %s2691_s20 = smov 0  }
  0x15   :  { %s2693_s21 = smov 0   ;;  %s2695_s22 = smov 0  }
  0x16   :  { %s2697_s23 = smov 0   ;;  %s2699_s24 = smov 0  }
  0x17   :  { %s2701_s25 = smov 0   ;;  %s2703_s26 = smov 0  }
  0x18   :  { %s2705_s27 = smov 0  }
  0x19 LB: > { %3138 = sst [smem:[#allocation25_spill]] %s2583_s20  ;;  %s2613_s28 = smov [#allocation11]   ;;  %s2611_s27 = sphi %s2705_s27, %s33_s27   ;;  %s2607_s26 = sphi %s2703_s26, %s3194_s26   ;;  %s2603_s25 = sphi %s2701_s25, %s3193_s25   ;;  %s2599_s24 = sphi %s2699_s24, %s3192_s24   ;;  %s2595_s23 = sphi %s2697_s23, %s3191_s23   ;;  %s2591_s22 = sphi %s2695_s22, %s3190_s22   ;;  %s2587_s21 = sphi %s2693_s21, %s3189_s21   ;;  %s2583_s20 = sphi %s2691_s20, %s3188_s20   ;;  %s2579_s19 = sphi %s2689_s19, %s3187_s19   ;;  %s2575_s18 = sphi %s2687_s18, %s3186_s18   ;;  %s2571_s17 = sphi %s2685_s17, %s3185_s17  }
  0x1a   : > { %3139 = sst [smem:[#allocation26_spill]] %s2595_s23  ;;  %s342_s29 = sshll.u32 %s2613_s28, 4  ;;  %s343_s29 = int_to_ptr.vmem [resolvable:$true] %s342_s29 }
  0x1b   : > { %3140 = sst [smem:[#allocation27_spill]] %s2599_s24  ;;  %s2741_s30 = sadd.s32 4294967295, %s2611_s27  }
  0x1c   : > { %p1717_p0 = scmp.ge.s32.totalorder %s2611_s27, 1  ;;  %p3125_p1 = scmp.eq.s32.totalorder %s2741_s30, 0 }
  0x1d   : > { %p321_p2 = scmp.lt.s32.totalorder %s2611_s27, 5  ;;  %s2614_s13 = smov [#allocation12]  }
  0x1e   : > { %s358_s14 = sshll.u32 %s2614_s13, 4  ;;  %s2311_s16 = scalar_lea.vmem %s343_s29, 1024  ;;  %s359_s14 = int_to_ptr.vmem [resolvable:$true] %s358_s14 }
  0x1f   : > { %p2746_p3 = pnand %p1717_p0, %p321_p2  ;;  %p2312_p7 = scmp.ne.s32.totalorder %s343_s29, %s2311_s16 }
  0x20   : > { %p2319_p10 = scmp.lt.s32.totalorder %s343_s29, %s343_s29  ;;  %p2320_p11 = scmp.lt.s32.totalorder %s2311_s16, %s2311_s16 }
  0x21   : > { %p2078_p4 = pneg %p2746_p3 }
  0x22   : > { %p2321_p12 = por %p2320_p11, %p2319_p10 }
  0x23   : > { %p2754_p5 = pnand %p2078_p4, %p3125_p1 }
  0x25   : > { %p2302_p6 = pneg %p2754_p5 }
  0x27   : > { %p2314_p8 = pnand %p2312_p7, %p2302_p6 }
  0x29   : > { %p2315_p9 = pneg %p2314_p8 }
  0x2b   : > { %p2322_p13 = pnand %p2321_p12, %p2315_p9 }
  0x2d   : > { %2325 = shalt.err (!%p2322_p13)
}
  0x2e   : > { %s3117_s28 = smov 64   ;;  %s3119_s13 = smov 4  }
  0x2f   : > { %s3143_s3 = sld [smem:[#allocation32_spill]]  ;;  %s2337_s24 = scalar_lea.vmem %s359_s14, 1024 }
  0x30   : > { %p2338_p0 = scmp.ne.s32.totalorder %s359_s14, %s2337_s24  ;;  %p2345_p7 = scmp.lt.s32.totalorder %s359_s14, %s359_s14 }
  0x31   : > { %p2346_p8 = scmp.lt.s32.totalorder %s2337_s24, %s2337_s24 }
  0x32   : > { %p2340_p2 = pnand %p2338_p0, %p2302_p6 }
  0x33   : > { %p2347_p9 = por %p2346_p8, %p2345_p7 }
  0x34   : > { %p2341_p4 = pneg %p2340_p2 }
  0x35   : > { %2084 = dma.hbm_to_vmem [thread:$0]  (!%p2754_p5), %s3143_s3, 1024, %s343_s29, [#allocation10], %s3117_s28, %s3117_s28, %s3119_s13  }
  0x36   : > { %p2348_p10 = pnand %p2347_p9, %p2341_p4 }
  0x38   : > { %2351 = shalt.err (!%p2348_p10)
}
  0x39   : > { %s3144_s5 = sld [smem:[#allocation34_spill]]  ;;  %s2617_s10 = smov [#allocation4]  }
  0x3a   : > { %s3145_s0 = sld [smem:[#allocation31_spill]]  ;;  %s2618_s24 = smov [#allocation14]  }
  0x3b   : > { %s374_s3 = sshll.u32 %s2618_s24, 4  ;;  %s2619_s8 = smov [#allocation15]   ;;  %s375_s3 = int_to_ptr.vmem [resolvable:$true] %s374_s3 }
  0x3c   : > { %s390_s6 = sshll.u32 %s2619_s8, 4  ;;  %s2374_s23 = scalar_lea.vmem %s375_s3, 1024  ;;  %s391_s6 = int_to_ptr.vmem [resolvable:$true] %s390_s6 }
  0x3d   : > { %p2375_p11 = scmp.ne.s32.totalorder %s375_s3, %s2374_s23  ;;  %p2382_p0 = scmp.lt.s32.totalorder %s375_s3, %s375_s3 }
  0x3e   : > { %p2383_p2 = scmp.lt.s32.totalorder %s2374_s23, %s2374_s23 }
  0x3f   : > { %2087 = dma.hbm_to_vmem [thread:$0]  (!%p2754_p5), %s3144_s5, 1024, %s359_s14, [#allocation13], %s3117_s28, %s3117_s28, %s3119_s13  }
  0x40   : > { %2081 = dma.hbm_to_smem (!%p2754_p5), %s3145_s0, 16, %s2617_s10, [#allocation7]  }
  0x41   : > { %p2377_p12 = pnand %p2375_p11, %p2302_p6  ;;  %p2384_p4 = por %p2383_p2, %p2382_p0 }
  0x43   : > { %p2378_p13 = pneg %p2377_p12 }
  0x45   : > { %p2385_p7 = pnand %p2384_p4, %p2378_p13 }
  0x47   : > { %2388 = shalt.err (!%p2385_p7)
}
  0x48   : > { %s3146_s7 = sld [smem:[#allocation36_spill]]  ;;  %s2400_s8 = scalar_lea.vmem %s391_s6, 1024 }
  0x49   : > { %p2401_p8 = scmp.ne.s32.totalorder %s391_s6, %s2400_s8  ;;  %p2408_p11 = scmp.lt.s32.totalorder %s391_s6, %s391_s6 }
  0x4a   : > { %p2409_p12 = scmp.lt.s32.totalorder %s2400_s8, %s2400_s8 }
  0x4b   : > { %p2403_p9 = pnand %p2401_p8, %p2302_p6 }
  0x4c   : > { %p2410_p13 = por %p2409_p12, %p2408_p11 }
  0x4d   : > { %p2404_p10 = pneg %p2403_p9 }
  0x4e   : > { %2090 = dma.hbm_to_vmem [thread:$0]  (!%p2754_p5), %s3146_s7, 1024, %s375_s3, [#allocation13], %s3117_s28, %s3117_s28, %s3119_s13  }
  0x4f   : > { %p2411_p0 = pnand %p2410_p13, %p2404_p10 }
  0x51   : > { %2414 = shalt.err (!%p2411_p0)
}
  0x52   : > { %s3147_s9 = sld [smem:[#allocation38_spill]]  ;;  %s1716_s3 = sadd.s32 4294967294, %s2611_s27  }
  0x53   : > { %s42_s15 = sadd.s32 1, %s2603_s25  ;;  %s45_s10 = sadd.s32 1, %s2607_s26 }
  0x54   : > { %p43_p6 = scmp.ge.s32.totalorder %s42_s15, 2  ;;  %s75_s11 = sadd.s32 1, %s2591_s22 }
  0x55   : > { %p82_p2 = scmp.ne.s32.totalorder %s2591_s22, %s2587_s21  ;;  %p3126_p4 = scmp.eq.s32.totalorder %s2611_s27, 0 }
  0x56   : > { %s3196_s15 = smov (%p43_p6, %s42_s15), 0  ;;  %s3198_s10 = smov (!%p43_p6, %s45_s10), %s2607_s26 }
  0x57   : > { %3148 = sst [smem:[#allocation28_spill]] %s3196_s15  ;;  %s71_s29 = ssub.s32 %s2603_s25, %s3196_s15 }
  0x58   : > { %2093 = dma.hbm_to_vmem [thread:$0]  (!%p2754_p5), %s3147_s9, 1024, %s391_s6, [#allocation16], %s3117_s28, %s3117_s28, %s3119_s13  }
  0x59   : > { %p2823_p7 = por %p3126_p4, %p82_p2  ;;  %p47_p5 = scmp.ge.s32.totalorder %s3198_s10, 2 }
  0x5a   : > { %p88_p8 = scmp.ne.s32.totalorder %s2587_s21, %s2583_s20  ;;  %p308_p9 = scmp.eq.s32.totalorder %s2741_s30, 3 }
  0x5b   : > { %p314_p10 = scmp.eq.s32.totalorder %s1716_s3, 3  ;;  %s3200_s10 = smov (%p47_p5, %s3198_s10), 0 }
  0x5c   : > { %3150 = sst [smem:[#allocation29_spill]] %s3200_s10  ;;  %p2834_p11 = por %p3125_p1, %p88_p8 }
  0x5d   : > { %p2838_p12 = por %p308_p9, %p82_p2  ;;  %s2844_s14 = ssub.s32 %s2607_s26, %s3200_s10 }
  0x5e   : > { %p2846_p13 = por %p314_p10, %p88_p8  ;;  %s72_s23 = sor.u32 %s71_s29, %s2844_s14 }
  0x5f   : > { %s3152_s4 = scalar_select %p2838_p12, 1, 0 }
  0x60   : > { %s3153_s8 = scalar_select %p2846_p13, 1, 0 }
  0x61   : > { %p73_p6 = scmp.eq.s32.totalorder %s72_s23, 0  ;;  %p2110_p5 = scmp.lt.s32.totalorder %s2611_s27, 4 }
  0x62   : > { %3154 = sst [smem:[#allocation30_spill]] %s3153_s8  ;;  %s407_s16 = sand.u32 1, %s2591_s22  }
  0x63   : > { %s1725_s3 = sshll.u32 %s2603_s25, 2  ;;  %s1724_s13 = sshll.u32 %s407_s16, 4 }
  0x64   : > { %s2856_s28 = scalar_select %p73_p6, %s2591_s22, %s75_s11  }
  0x65   : > { %s1726_s0 = sshll.u32 %s2607_s26, 3  ;;  %s411_s7 = scalar_lea.vmem [#allocation8], %s1724_s13 }
  0x66   : > { %s417_s5 = sadd.s32 %s1726_s0, %s1725_s3  ;;  %s420_s9 = sshll.u32 %s411_s7, 4  ;;  %s421_s9 = int_to_ptr.vmem [resolvable:$true] %s420_s9 }
  0x67   : > { %s1727_s10 = sshll.u32 %s417_s5, 6  ;;  %p2866_p2 = pnand %p2110_p5, %p2823_p7 }
  0x68   : > { %s419_s8 = scalar_lea.hbm %s3104_s1, %s1727_s10  ;;  %s408_s11 = scalar_lea.sflag [#allocation5], %s407_s16 }
  0x69   : > { %p2417_p8 = pneg %p2866_p2  ;;  %s2428_s23 = scalar_lea.vmem %s421_s9, 256 }
  0x6a   : > { %p2429_p9 = scmp.ne.s32.totalorder %s421_s9, %s2428_s23  ;;  %s2620_s0 = smov [#allocation8]  }
  0x6b   : > { %s2433_s5 = sshll.u32 %s2620_s0, 4  ;;  %s2434_s5 = int_to_ptr.vmem [resolvable:$false] %s2433_s5 }
  0x6c   : > { %p2431_p10 = pnand %p2429_p9, %p2417_p8  ;;  %s2435_s7 = scalar_lea.vmem %s2434_s5, 512 }
  0x6d   : > { %p2436_p1 = scmp.lt.s32.totalorder %s421_s9, %s2434_s5  ;;  %p2437_p4 = scmp.lt.s32.totalorder %s2435_s7, %s2428_s23 }
  0x6e   : > { %p2432_p6 = pneg %p2431_p10 }
  0x6f   : > { %p2438_p0 = por %p2437_p4, %p2436_p1 }
  0x71   : > { %p2439_p13 = pnand %p2438_p0, %p2432_p6 }
  0x73   : > { %2442 = shalt.err (!%p2439_p13)
}
  0x74   : > { %s3156_s20 = smov 4   ;;  %s3157_s13 = smov 64  }
  0x75   : > { %2097 = dma.hbm_to_vmem [thread:$0]  (!%p2866_p2), %s419_s8, 256, %s421_s9, %s408_s11, %s3157_s13, %s3157_s13, %s3156_s20  }
  0x76   : > { %s101_s15 = sadd.s32 1, %s2579_s19  ;;  %p3158_p1 = scmp.eq.s32.totalorder %s2844_s14, 0 }
  0x77   : > { %p108_p4 = scmp.ne.s32.totalorder %s2579_s19, %s2575_s18  ;;  %p114_p7 = scmp.ne.s32.totalorder %s2575_s18, %s2571_s17 }
  0x78   : > { %s2881_s10 = scalar_select %p3158_p1, %s2579_s19, %s101_s15  }
  0x79   : > { %s430_s6 = sand.u32 1, %s2611_s27   ;;  %s432_s16 = sand.u32 1, %s2579_s19  }
  0x7a   : > { %p3159_p13 = scmp.eq.s32.totalorder %s2611_s27, 0  ;;  %p3160_p8 = scmp.eq.s32.totalorder %s2741_s30, 0 }
  0x7b   : > { %s1728_s29 = sshll.u32 %s432_s16, 5  ;;  %s1821_s23 = sshll.u32 %s2607_s26, 9 }
  0x7c   : > { %p110_p0 = por %p108_p4, %p3159_p13  ;;  %p2893_p9 = por %p114_p7, %p3160_p8 }
  0x7d   : > { %s440_s9 = scalar_lea.hbm %s3105_s2, %s1821_s23  ;;  %s434_s14 = scalar_lea.vmem [#allocation9], %s1728_s29 }
  0x7e   : > { %s441_s8 = sshll.u32 %s434_s14, 4  ;;  %p2903_p2 = pnand %p2110_p5, %p110_p0  ;;  %s442_s8 = int_to_ptr.vmem [resolvable:$true] %s441_s8 }
  0x7f   : > { %s431_s11 = scalar_lea.sflag [#allocation10], %s430_s6  ;;  %s2456_s7 = scalar_lea.vmem %s442_s8, 512 }
  0x80   : > { %p2445_p10 = pneg %p2903_p2  ;;  %p2457_p6 = scmp.ne.s32.totalorder %s442_s8, %s2456_s7 }
  0x81   : > { %s2621_s15 = smov [#allocation9]  }
  0x82   : > { %p2459_p1 = pnand %p2457_p6, %p2445_p10  ;;  %s2461_s16 = sshll.u32 %s2621_s15, 4  ;;  %s2462_s16 = int_to_ptr.vmem [resolvable:$false] %s2461_s16 }
  0x83   : > { %s2463_s23 = scalar_lea.vmem %s2462_s16, 1024  ;;  %p2464_p7 = scmp.lt.s32.totalorder %s442_s8, %s2462_s16 }
  0x84   : > { %p2460_p4 = pneg %p2459_p1  ;;  %p2465_p13 = scmp.lt.s32.totalorder %s2463_s23, %s2456_s7 }
  0x86   : > { %p2466_p8 = por %p2465_p13, %p2464_p7 }
  0x88   : > { %p2467_p12 = pnand %p2466_p8, %p2460_p4 }
  0x8a   : > { %2470 = shalt.err (!%p2467_p12)
}
  0x8b   : > { %2100 = dma.hbm_to_vmem [thread:$0]  (!%p2903_p2), %s440_s9, 512, %s442_s8, %s431_s11, %s3157_s13, %s3157_s13, %s3156_s20  }
  0x8c   : > { %453 = sbr.rel (%p2746_p3) target bundleno = 1612 (0x64c), region = 64  ;;  %p3163_p5 = scmp.eq.s32.totalorder (!%p2746_p3), %s2741_s30, 0 }
  0x91   : > { %2542 = dma.done.wait (%p3163_p5), [#allocation7], 16   ;;  %p3164_p0 = pmov %p3163_p5 }
  0x92   : > { %s2921_s6 = sand.u32 1, %s2587_s21  }
  0x93   : > { %2544 = vsyncadd (%p3164_p0), [#allocation7], 4294967280  ;;  %s1733_s29 = sshll.u32 %s2921_s6, 4  ;;  %s460_s0 = scalar_lea.sflag [#allocation5], %s2921_s6 }
  0x94   : > { %s2925_s5 = scalar_lea.vmem [#allocation8], %s1733_s29 }
  0x95   : > { %2546 = dma.done.wait (%p2834_p11), %s460_s0, 256  }
  0x96   : > { %2548 = vsyncadd (%p2834_p11), %s460_s0, 4294967040  ;;  %s468_s12 = sand.u32 1, %s2741_s30   ;;  %s470_s20 = sand.u32 1, %s2575_s18  }
  0x97   : > { %s1734_s13 = sshll.u32 %s470_s20, 5  ;;  %s469_s9 = scalar_lea.sflag [#allocation10], %s468_s12 }
  0x98   : > { %s2933_s14 = scalar_lea.vmem [#allocation9], %s1734_s13 }
  0x99   : > { %2550 = dma.done.wait (%p2893_p9), %s469_s9, 512  }
  0x9a   : > { %2552 = vsyncadd (%p2893_p9), %s469_s9, 4294966784  ;;  %p3165_p3 = pmov %p3164_p0 }
  0x9b   : > { %p3166_p12 = pmov %p3164_p0 }
  0x9c   : > { %2554 = dma.done.wait (%p3165_p3), [#allocation10], 1024  }
  0x9d   : > { %2556 = vsyncadd (%p3166_p12), [#allocation10], 4294966272  ;;  %p3167_p11 = pmov %p3164_p0 }
  0x9e   : > { %p3168_p2 = pmov %p3164_p0 }
  0x9f   : > { %2558 = dma.done.wait (%p3167_p11), [#allocation13], 2048  }
  0xa0   : > { %2560 = vsyncadd (%p3168_p2), [#allocation13], 4294965248  ;;  %p3169_p10 = pmov %p3164_p0 }
  0xa1   : > { %p3170_p6 = pmov %p3164_p0 }
  0xa2   : > { %2562 = dma.done.wait (%p3169_p10), [#allocation16], 1024  }
  0xa3   : > { %2564 = vsyncadd (%p3170_p6), [#allocation16], 4294966272 }
  0xa4   : > { %493 = sfence }
  0xa5   : > { %s1739_s24 = sshll.u32 %s2921_s6, 5  ;;  %s3171_s8 = sld [smem:[#allocation26_spill]] }
  0xa6   : > { %s2952_s3 = scalar_lea.vmem [#allocation17], %s1739_s24 }
  0xab   : > { %p1740_p9 = scmp.ne.s32.totalorder %s3171_s8, 0 }
  0xac   : > { %s3172_s11 = sld [smem:[#allocation35_spill]] (!%p1740_p9) }
  0xad   : > { %539 = sbr.rel (%p1740_p9) target bundleno = 424 (0x1a8), region = 96  ;;  %s3173_s16 = sld [smem:[#allocation37_spill]] (!%p1740_p9) }
  0xb2   : > { %v2214_v0 = vld [vmem:[#allocation12 + $0x38] sm:$0xff]   ;;  %v2216_v2 = vld [vmem:[#allocation12 + $0x30] sm:$0xff]   ;;  %v2218_v4 = vld [vmem:[#allocation12 + $0x28] sm:$0xff]  }
  0xb3   : > { %v2215_v1 = vld [vmem:[#allocation14 + $0x38] sm:$0xff]   ;;  %1940 = vmatprep.subr.bf16.mxu0 %v2214_v0  ;;  %v2217_v3 = vld [vmem:[#allocation14 + $0x30] sm:$0xff]   ;;  %v2219_v5 = vld [vmem:[#allocation14 + $0x28] sm:$0xff]  }
  0xb4   : > { %1964 = vmatprep.subr.bf16.mxu1 %v2215_v1  ;;  %1941 = vmatpush3.bf16.msra.mxu0 %v2214_v0  ;;  %v2220_v6 = vld [vmem:[#allocation12 + $0x20] sm:$0xff]   ;;  %v2222_v8 = vld [vmem:[#allocation12 + $0x18] sm:$0xff]   ;;  %v2224_v10 = vld [vmem:[#allocation12 + $0x10] sm:$0xff]  }
  0xb5   : > { %1965 = vmatpush3.bf16.msra.mxu1 %v2215_v1  ;;  %1942 = vmatprep.subr.bf16.mxu0 %v2216_v2  ;;  %v2221_v7 = vld [vmem:[#allocation14 + $0x20] sm:$0xff]   ;;  %v2223_v9 = vld [vmem:[#allocation14 + $0x18] sm:$0xff]   ;;  %v2225_v12 = vld [vmem:[#allocation14 + $0x10] sm:$0xff]  }
  0xb6   : > { %1966 = vmatprep.subr.bf16.mxu1 %v2217_v3  ;;  %v2230_v11 = vld [vmem:[%s2933_s14] sm:$0xff]   ;;  %v2226_v13 = vld [vmem:[#allocation12 + $0x8] sm:$0xff]   ;;  %v2232_v18 = vld [vmem:[%s2933_s14 + $0x10] sm:$0xff]  }
  0xb7   : > { %1956 = vmatprep.mubr.bf16.mxu0 %v2230_v11  ;;  %1980 = vmatprep.mubr.bf16.mxu1 %v2230_v11  ;;  %v2227_v14 = vld [vmem:[#allocation14 + $0x8] sm:$0xff]   ;;  %v2228_v15 = vld [vmem:[#allocation12] sm:$0xff]   ;;  %v2233_v19 = vld [vmem:[%s2933_s14 + $0x18] sm:$0xff]  }
  0xb8   : > { %1943 = vmatpush3.bf16.msra.mxu0 %v2216_v2  ;;  %v2229_v16 = vld [vmem:[#allocation14] sm:$0xff]   ;;  %v2231_v17 = vld [vmem:[%s2933_s14 + $0x8] sm:$0xff]  }
  0xb9   : > { %1967 = vmatpush3.bf16.msra.mxu1 %v2217_v3  ;;  %1944 = vmatprep.subr.bf16.mxu0 %v2218_v4  ;;  %v1741_v22 = vld [vmem:[%s3172_s11] ss:$0 sm:$0xff] }
  0xba   : > { %1968 = vmatprep.subr.bf16.mxu1 %v2219_v5  ;;  %v1762_v24 = vld [vmem:[%s3173_s16] ss:$0 sm:$0xff] }
  0xbc   : > { %1945 = vmatpush3.bf16.msra.mxu0 %v2218_v4 }
  0xbd   : > { %1969 = vmatpush3.bf16.msra.mxu1 %v2219_v5  ;;  %1946 = vmatprep.subr.bf16.mxu0 %v2220_v6 }
  0xbe   : > { %1970 = vmatprep.subr.bf16.mxu1 %v2221_v7 }
  0xc0   : > { %1947 = vmatpush3.bf16.msra.mxu0 %v2220_v6 }
  0xc1   : > { %1971 = vmatpush3.bf16.msra.mxu1 %v2221_v7  ;;  %1948 = vmatprep.subr.bf16.mxu0 %v2222_v8 }
  0xc2   : > { %1972 = vmatprep.subr.bf16.mxu1 %v2223_v9 }
  0xc4   : > { %1949 = vmatpush3.bf16.msra.mxu0 %v2222_v8 }
  0xc5   : > { %1973 = vmatpush3.bf16.msra.mxu1 %v2223_v9  ;;  %1950 = vmatprep.subr.bf16.mxu0 %v2224_v10 }
  0xc6   : > { %1974 = vmatprep.subr.bf16.mxu1 %v2225_v12 }
  0xc8   : > { %1951 = vmatpush3.bf16.msra.mxu0 %v2224_v10 }
  0xc9   : > { %1975 = vmatpush3.bf16.msra.mxu1 %v2225_v12  ;;  %1952 = vmatprep.subr.bf16.mxu0 %v2226_v13 }
  0xca   : > { %1976 = vmatprep.subr.bf16.mxu1 %v2227_v14 }
  0xcc   : > { %1953 = vmatpush3.bf16.msra.mxu0 %v2226_v13 }
  0xcd   : > { %1977 = vmatpush3.bf16.msra.mxu1 %v2227_v14  ;;  %1954 = vmatprep.subr.bf16.mxu0 %v2228_v15 }
  0xce   : > { %1978 = vmatprep.subr.bf16.mxu1 %v2229_v16 }
  0xd0   : > { %1955 = vmatpush3.bf16.msra.mxu0 %v2228_v15 }
  0xd1   : > { %1979 = vmatpush3.bf16.msra.mxu1 %v2229_v16 }
  0xd3   : > { %1957 = vmatmul.mubr.bf16.vlgmr.msra.gmra.mxu0 %v2231_v17 }
  0xd4   : > { %1981 = vmatmul.mubr.bf16.vlgmr.msra.gmra.mxu1 %v2231_v17  ;;  %1960 = vmatprep.mubr.bf16.mxu0 %v2232_v18 }
  0xd5   : > { %1984 = vmatprep.mubr.bf16.mxu1 %v2232_v18 }
  0xdb   : > { %1961 = vmatmul.mubr.bf16.gmra.mxu0 %v2233_v19 }
  0xdc   : > { %1985 = vmatmul.mubr.bf16.gmra.mxu1 %v2233_v19 }
 0x193   : > { %v1958_v20 = vpop.f32.mrf.mxu0 }
 0x194   : > { %v1982_v21 = vpop.f32.mrf.mxu1  ;;  %v686_v27 = vadd.f32 %v1958_v20, %v1741_v22 }
 0x195   : > { %v677_v23 = vpop.f32.mrf.mxu0  ;;  %v862_v30 = vadd.f32 %v1982_v21, %v1762_v24 }
 0x196   : > { %v853_v25 = vpop.f32.mrf.mxu1  ;;  %v678_v33 = vadd.f32 %v1741_v22, %v677_v23 }
 0x197   : > { %v1959_v26 = vpop.f32.mrf.mxu0  ;;  %v854_v37 = vadd.f32 %v1762_v24, %v853_v25 }
 0x198   : > { %v689_v28 = vadd.f32 %v1959_v26, %v1741_v22  ;;  %v1983_v29 = vpop.f32.mrf.mxu1 }
 0x199   : > { %v865_v31 = vadd.f32 %v1983_v29, %v1762_v24  ;;  %v680_v32 = vpop.f32.mrf.mxu0 }
 0x19a   : > { %v1846_v34 = vpack.c.bf16 %v689_v28, %v686_v27  ;;  %v681_v35 = vadd.f32 %v1741_v22, %v680_v32  ;;  %v856_v36 = vpop.f32.mrf.mxu1 }
 0x19b   : > { %v1866_v38 = vpack.c.bf16 %v865_v31, %v862_v30  ;;  %v857_v39 = vadd.f32 %v1762_v24, %v856_v36  ;;  %v1962_v40 = vpop.f32.mrf.mxu0 }
 0x19c   : > { %1878 = vst [vmem:[#allocation2 + $0x8] sm:$0xff] %v1846_v34   ;;  %v1841_v41 = vpack.c.bf16 %v681_v35, %v678_v33  ;;  %v1986_v42 = vpop.f32.mrf.mxu1  ;;  %v702_v47 = vadd.f32 %v1962_v40, %v1741_v22 }
 0x19d   : > { %1881 = vst [vmem:[#allocation3 + $0x8] sm:$0xff] %v1866_v38   ;;  %v1861_v43 = vpack.c.bf16 %v857_v39, %v854_v37  ;;  %v693_v44 = vpop.f32.mrf.mxu0  ;;  %v878_v50 = vadd.f32 %v1986_v42, %v1762_v24 }
 0x19e   : > { %1842 = vst [vmem:[#allocation2] sm:$0xff] %v1841_v41   ;;  %v869_v45 = vpop.f32.mrf.mxu1  ;;  %v694_v53 = vadd.f32 %v1741_v22, %v693_v44 }
 0x19f   : > { %1862 = vst [vmem:[#allocation3] sm:$0xff] %v1861_v43   ;;  %v1963_v46 = vpop.f32.mrf.mxu0  ;;  %v870_v57 = vadd.f32 %v1762_v24, %v869_v45 }
 0x1a0   : > { %v705_v48 = vadd.f32 %v1963_v46, %v1741_v22  ;;  %v1987_v49 = vpop.f32.mrf.mxu1 }
 0x1a1   : > { %v881_v51 = vadd.f32 %v1987_v49, %v1762_v24  ;;  %v696_v52 = vpop.f32.mrf.mxu0 }
 0x1a2   : > { %v1856_v54 = vpack.c.bf16 %v705_v48, %v702_v47  ;;  %v697_v55 = vadd.f32 %v1741_v22, %v696_v52  ;;  %v872_v56 = vpop.f32.mrf.mxu1 }
 0x1a3   : > { %v1876_v58 = vpack.c.bf16 %v881_v51, %v878_v50  ;;  %v873_v59 = vadd.f32 %v1762_v24, %v872_v56 }
 0x1a4   : > { %1880 = vst [vmem:[#allocation2 + $0x18] sm:$0xff] %v1856_v54   ;;  %v1851_v60 = vpack.c.bf16 %v697_v55, %v694_v53 }
 0x1a5   : > { %1883 = vst [vmem:[#allocation3 + $0x18] sm:$0xff] %v1876_v58   ;;  %v1871_v61 = vpack.c.bf16 %v873_v59, %v870_v57 }
 0x1a6   : > { %1879 = vst [vmem:[#allocation2 + $0x10] sm:$0xff] %v1851_v60  }
 0x1a7   : > { %1882 = vst [vmem:[#allocation3 + $0x10] sm:$0xff] %v1871_v61  }
 0x1a8 PF: > { %v2234_v62 = vld [vmem:[#allocation11 + $0x38] sm:$0xff]   ;;  %v2235_v63 = vld [vmem:[#allocation11 + $0x30] sm:$0xff]   ;;  %v2236_v0 = vld [vmem:[#allocation11 + $0x28] sm:$0xff]   ;;  %s3174_s0 = sld [smem:[#allocation33_spill]]  ;;  %v1075_v27 = vlaneseq  ;;  %vm1216_vm0 = vcmask 523264   ;;  %s1552_s15 = sshll.u32 %s2952_s3, 4  ;;  %s3039_s15 = int_to_ptr.vmem [resolvable:$true] %s1552_s15 }
 0x1a9   : > { %1988 = vmatprep.subr.bf16.mxu0 %v2234_v62  ;;  %v2237_v1 = vld [vmem:[#allocation11 + $0x20] sm:$0xff]   ;;  %v2238_v5 = vld [vmem:[#allocation11 + $0x18] sm:$0xff]   ;;  %v2239_v6 = vld [vmem:[#allocation11 + $0x10] sm:$0xff]   ;;  %s3175_s12 = sld [smem:[#allocation26_spill]]  ;;  %p3179_p4 = scmp.ne.s32.totalorder %s3152_s4, 0 }
 0x1aa   : > { %1989 = vmatpush3.bf16.msra.mxu0 %v2234_v62  ;;  %v2242_v2 = vld [vmem:[%s2925_s5] sm:$0xff]   ;;  %v2246_v7 = vld [vmem:[#allocation2 + $0x8] sm:$0xff]   ;;  %v1076_v28 = vshrl.u32 %v1075_v27, 7  ;;  %v1086_v32 = vand.u32 127, %v1075_v27  ;;  %s1091_s20 = sld [smem:[#allocation4]] }
 0x1ab   : > { %1990 = vmatprep.subr.bf16.mxu0 %v2235_v63  ;;  %2004 = vmatprep.mubr.bf16.mxu0 %v2242_v2  ;;  %v2244_v3 = vld [vmem:[#allocation2 + $0x18] sm:$0xff]   ;;  %v2240_v8 = vld [vmem:[#allocation11 + $0x8] sm:$0xff]   ;;  %v2241_v9 = vld [vmem:[#allocation11] sm:$0xff]   ;;  %s1791_s13 = sld [smem:[#allocation4 + $0x1]] }
 0x1ac   : > { %2008 = vmatprep.subr.bf16.mxu1 %v2244_v3  ;;  %v2243_v10 = vld [vmem:[%s2925_s5 + $0x8] sm:$0xff]   ;;  %v2247_v11 = vld [vmem:[#allocation2] sm:$0xff]   ;;  %v1078_v29 = vadd.s32 16, %v1076_v28  ;;  %v1079_v33 = vadd.s32 24, %v1076_v28  ;;  %v1077_v35 = vadd.s32 8, %v1076_v28  ;;  %s3176_s9 = sld [smem:[#allocation27_spill]] }
 0x1ad   : > { %v2245_v4 = vld [vmem:[#allocation2 + $0x10] sm:$0xff]   ;;  %2009 = vmatpush3.bf16.xpose.msra.mxu1 %v2244_v3  ;;  %s3177_s17 = sld [smem:[#allocation39_spill]] }
 0x1ae   : > { %1991 = vmatpush3.bf16.msra.mxu0 %v2235_v63  ;;  %2010 = vmatprep.subr.bf16.mxu1 %v2245_v4  ;;  %v1779_v14 = vld [vmem:[%s3174_s0] ss:$0 sm:$0xff]  ;;  %s3178_s29 = sld [smem:[#allocation40_spill]] }
 0x1af   : > { %1992 = vmatprep.subr.bf16.mxu0 %v2236_v0  ;;  %s1790_s5 = sshll.u32 %s3175_s12, 5  ;;  %s1816_s14 = sshll.u32 %s3175_s12, 2 }
 0x1b0   : > { %v1080_v30 = vstv %s1790_s5  ;;  %v1101_v45 = vstv %s1091_s20  ;;  %s1537_s12 = scalar_lea.sflag [#allocation6], %s2921_s6  ;;  %s2471_s5 = scalar_lea.vmem %s3039_s15, 512 }
 0x1b1   : > { %v1083_v31 = vadd.s32 %v1080_v30, %v1078_v29  ;;  %v1081_v34 = vadd.s32 %v1080_v30, %v1076_v28  ;;  %v1084_v37 = vadd.s32 %v1080_v30, %v1079_v33  ;;  %v1082_v39 = vadd.s32 %v1080_v30, %v1077_v35  ;;  %p2472_p1 = scmp.ne.s32.totalorder %s3039_s15, %s2471_s5  ;;  %s2622_s20 = smov [#allocation17]  }
 0x1b2   : > { %1993 = vmatpush3.bf16.msra.mxu0 %v2236_v0  ;;  %v1106_v50 = vstv %s1791_s13  ;;  %s1817_s24 = sshll.u32 %s3176_s9, 3  ;;  %s2475_s13 = sshll.u32 %s2622_s20, 4  ;;  %s2476_s13 = int_to_ptr.vmem [resolvable:$false] %s2475_s13 }
 0x1b3   : > { %1994 = vmatprep.subr.bf16.mxu0 %v2237_v1  ;;  %v1089_v36 = vsub.s32 %v1083_v31, %v1086_v32  ;;  %v1087_v38 = vsub.s32 %v1081_v34, %v1086_v32  ;;  %v2971_v41 = vsub.s32 %v1084_v37, %v1086_v32  ;;  %v1088_v43 = vsub.s32 %v1082_v39, %v1086_v32  ;;  %s1549_s11 = sadd.s32 %s1817_s24, %s1816_s14  ;;  %p2473_p7 = pnand %p2472_p1, %p3179_p4 }
 0x1b4   : > { %s1818_s7 = sshll.u32 %s1549_s11, 7  ;;  %s2477_s9 = scalar_lea.vmem %s2476_s13, 1024 }
 0x1b5   : > { %2011 = vmatpush3.bf16.xpose.msra.mxu1 %v2245_v4  ;;  %v1095_v40 = vcvt.s32.f32 %v1089_v36  ;;  %v1093_v42 = vcvt.s32.f32 %v1087_v38  ;;  %v1096_v46 = vcvt.s32.f32 %v2971_v41  ;;  %v1094_v48 = vcvt.s32.f32 %v1088_v43  ;;  %s3037_s0 = scalar_lea.hbm %s3178_s29, %s1818_s7  ;;  %p2474_p13 = pneg %p2473_p7 }
 0x1b6   : > { %1995 = vmatpush3.bf16.msra.mxu0 %v2237_v1  ;;  %2012 = vmatprep.subr.bf16.mxu1 %v2246_v7  ;;  %p2478_p8 = scmp.lt.s32.totalorder %s3039_s15, %s2476_s13  ;;  %p2479_p5 = scmp.lt.s32.totalorder %s2477_s9, %s2471_s5 }
 0x1b7   : > { %1996 = vmatprep.subr.bf16.mxu0 %v2238_v5  ;;  %v1099_v44 = vmul.f32 %v1095_v40, %v1095_v40  ;;  %v1097_v47 = vmul.f32 %v1093_v42, %v1093_v42  ;;  %v1100_v51 = vmul.f32 %v1096_v46, %v1096_v46  ;;  %v1098_v53 = vmul.f32 %v1094_v48, %v1094_v48 }
 0x1b8   : > { %p2480_p0 = por %p2479_p5, %p2478_p8 }
 0x1b9   : > { %v1104_v49 = vmul.f32 %v1101_v45, %v1099_v44  ;;  %v1102_v52 = vmul.f32 %v1101_v45, %v1097_v47  ;;  %v1105_v55 = vmul.f32 %v1101_v45, %v1100_v51  ;;  %v1103_v57 = vmul.f32 %v1101_v45, %v1098_v53 }
 0x1ba   : > { %1997 = vmatpush3.bf16.msra.mxu0 %v2238_v5  ;;  %p2481_p3 = pnand %p2480_p0, %p2474_p13 }
 0x1bb   : > { %1998 = vmatprep.subr.bf16.mxu0 %v2239_v6  ;;  %v1109_v54 = vsub.f32 %v1104_v49, %v1106_v50  ;;  %v1107_v56 = vsub.f32 %v1102_v52, %v1106_v50  ;;  %v1110_v59 = vsub.f32 %v1105_v55, %v1106_v50  ;;  %v1108_v61 = vsub.f32 %v1103_v57, %v1106_v50 }
 0x1bd   : > { %2013 = vmatpush3.bf16.xpose.msra.mxu1 %v2246_v7  ;;  %v1113_v58 = vand.u32 2147483647, %v1109_v54  ;;  %v1111_v60 = vand.u32 2147483647, %v1107_v56  ;;  %v1114_v63 = vand.u32 2147483647, %v1110_v59 }
 0x1be   : > { %1999 = vmatpush3.bf16.msra.mxu0 %v2239_v6  ;;  %2014 = vmatprep.subr.bf16.mxu1 %v2247_v11  ;;  %v1112_v1 = vand.u32 2147483647, %v1108_v61 }
 0x1bf   : > { %2000 = vmatprep.subr.bf16.mxu0 %v2240_v8  ;;  %v1117_v62 = vsub.f32 0.0, %v1113_v58  ;;  %v1115_v0 = vsub.f32 0.0, %v1111_v60  ;;  %v1118_v3 = vsub.f32 0.0, %v1114_v63 }
 0x1c0   : > { %v1116_v5 = vsub.f32 0.0, %v1112_v1 }
 0x1c1   : > { %v1123_v2 = vmul.f32 1.442695, %v1117_v62  ;;  %v1119_v4 = vmul.f32 1.442695, %v1115_v0  ;;  %v1125_v6 = vmul.f32 1.442695, %v1118_v3 }
 0x1c2   : > { %2001 = vmatpush3.bf16.msra.mxu0 %v2240_v8  ;;  %v1121_v7 = vmul.f32 1.442695, %v1116_v5  ;;  %v1201_v8 = vsub.s32 0, %v1087_v38 }
 0x1c3   : > { %2002 = vmatprep.subr.bf16.mxu0 %v2241_v9  ;;  %2260 = vpow2.f32 %v1123_v2 }
 0x1c4   : > { %2262 = vpow2.f32 %v1119_v4 }
 0x1c5   : > { %2015 = vmatpush3.bf16.xpose.msra.mxu1 %v2247_v11  ;;  %2264 = vpow2.f32 %v1125_v6 }
 0x1c6   : > { %2003 = vmatpush3.bf16.msra.mxu0 %v2241_v9  ;;  %2266 = vpow2.f32 %v1121_v7 }
 0x1c9   : > { %2005 = vmatmul.mubr.bf16.vlgmr.msra.gmra.mxu0 %v2243_v10  ;;  %v1796_v10 = vmin.u32 %v1201_v8, %v1087_v38 }
 0x1cb   : > { %vm1212_vm1 = vcmp.le.s32.totalorder %v1796_v10, 8 }
 0x1d0   : > { %v2261_v9 = vpop.eup %2260 }
 0x1d1   : > { %v2263_v11 = vpop.eup %2262 }
 0x289   : > { %v2006_v12 = vpop.f32.mrf.mxu0 }
 0x28a   : > { %v1054_v18 = vadd.f32 %v2006_v12, %v1779_v14 }
 0x28b   : > { %v1045_v13 = vpop.f32.mrf.mxu0 }
 0x28c   : > { %v1046_v16 = vadd.f32 %v1779_v14, %v1045_v13  ;;  %v1062_v24 = vmul.f32 0.088388346, %v1054_v18  ;;  %v1204_v13 = vsub.s32 0, %v1088_v43 }
 0x28d   : > { %v2007_v15 = vpop.f32.mrf.mxu0 }
 0x28e   : > { %v1057_v17 = vadd.f32 %v2007_v15, %v1779_v14  ;;  %v1060_v22 = vmul.f32 0.088388346, %v1046_v16  ;;  %v1207_v15 = vsub.s32 0, %v1089_v36 }
 0x28f   : > { %v1048_v19 = vpop.f32.mrf.mxu0 }
 0x290   : > { %v1049_v20 = vadd.f32 %v1779_v14, %v1048_v19  ;;  %v1063_v21 = vmul.f32 0.088388346, %v1057_v17  ;;  %v2265_v17 = vpop.eup %2264 }
 0x292   : > { %v1061_v23 = vmul.f32 0.088388346, %v1049_v20  ;;  %v1065_v26 = vpack.c.bf16 %v1063_v21, %v1062_v24  ;;  %v2267_v20 = vpop.eup %2266 }
 0x294   : > { %v1064_v25 = vpack.c.bf16 %v1061_v23, %v1060_v22  ;;  %v1797_v22 = vmin.u32 %v1204_v13, %v1088_v43  ;;  %v1210_v23 = vsub.s32 0, %v2971_v41 }
 0x296   : > { %2016 = vmatprep.mubr.bf16.mxu1 %v1064_v25  ;;  %v1798_v25 = vmin.u32 %v1207_v15, %v1089_v36  ;;  %vm1213_vm2 = vcmp.le.s32.totalorder %v1797_v22, 8  ;;  %v1799_v31 = vmin.u32 %v1210_v23, %v2971_v41  ;;  %v2254_v22 = vld [vmem:[#allocation15 + $0x28] sm:$0xff]   ;;  %v2255_v23 = vld [vmem:[#allocation15 + $0x20] sm:$0xff]  }
 0x297   : > { %2017 = vmatmul.mubr.bf16.vlgmr.msra.gmra.mxu1 %v1065_v26 }
 0x298   : > { %vm1214_vm3 = vcmp.le.s32.totalorder %v1798_v25, 8  ;;  %vm1215_vm4 = vcmp.le.s32.totalorder %v1799_v31, 8  ;;  %v2257_v25 = vld [vmem:[#allocation15 + $0x10] sm:$0xff]  }
 0x357   : > { %v2018_v12 = vpop.f32.mrf.mxu1 }
 0x358   : > { %v1194_v14 = vadd.f32 %v2261_v9, %v2018_v12 }
 0x359   : > { %v1185_v16 = vpop.f32.mrf.mxu1 }
 0x35a   : > { %v1186_v18 = vadd.f32 %v2263_v11, %v1185_v16  ;;  %v1223_v19 = vsel %vm1216_vm0, %v1194_v14, -inf  ;;  %v1243_v35 = vsel %vm1214_vm3, %v1194_v14, -1e+09  ;;  %v2248_v16 = vld [vmem:[#allocation3 + $0x18] sm:$0xff]  }
 0x35b   : > { %1224 = vmax.xlane.f32.xlu0 %v1223_v19  ;;  %v2019_v21 = vpop.f32.mrf.mxu1  ;;  %v1251_v37 = vsel %vm1216_vm0, %v1243_v35, -inf  ;;  %2020 = vmatprep.subr.bf16.mxu0 %v2248_v16  ;;  %v2251_v19 = vld [vmem:[#allocation3] sm:$0xff]  }
 0x35c   : > { %v1241_v24 = vsel %vm1212_vm1, %v1186_v18, -1e+09  ;;  %v1197_v26 = vadd.f32 %v2265_v17, %v2019_v21  ;;  %v1217_v30 = vsel %vm1216_vm0, %v1186_v18, -inf  ;;  %2021 = vmatpush3.bf16.msra.mxu0 %v2248_v16  ;;  %v2249_v17 = vld [vmem:[#allocation3 + $0x10] sm:$0xff]  }
 0x35d   : > { %v1188_v27 = vpop.f32.mrf.mxu1  ;;  %v1245_v28 = vsel %vm1216_vm0, %v1241_v24, -inf  ;;  %2022 = vmatprep.subr.bf16.mxu0 %v2249_v17  ;;  %v2253_v21 = vld [vmem:[#allocation15 + $0x30] sm:$0xff]  }
 0x35e   : > { %v1189_v29 = vadd.f32 %v2267_v20, %v1188_v27  ;;  %1246 = vmax.xlane.f32.xlu1 %v1245_v28  ;;  %v1226_v32 = vsel %vm1216_vm0, %v1197_v26, -inf  ;;  %v1244_v38 = vsel %vm1215_vm4, %v1197_v26, -1e+09  ;;  %v2252_v20 = vld [vmem:[#allocation15 + $0x38] sm:$0xff]  }
 0x35f   : > { %1218 = vmax.xlane.f32.xlu0 %v1217_v30  ;;  %v1254_v39 = vsel %vm1216_vm0, %v1244_v38, -inf  ;;  %2032 = vmatprep.subr.bf16.mxu1 %v2252_v20 }
 0x360   : > { %v1220_v33 = vsel %vm1216_vm0, %v1189_v29, -inf  ;;  %v1242_v34 = vsel %vm1213_vm2, %v1189_v29, -1e+09  ;;  %2023 = vmatpush3.bf16.msra.mxu0 %v2249_v17  ;;  %2033 = vmatpush3.bf16.msra.mxu1 %v2252_v20 }
 0x361   : > { %v1248_v36 = vsel %vm1216_vm0, %v1242_v34, -inf  ;;  %2034 = vmatprep.subr.bf16.mxu1 %v2253_v21 }
 0x362   : > { %1227 = vmax.xlane.f32.xlu1 %v1226_v32 }
 0x363   : > { %1221 = vmax.xlane.f32.xlu0 %v1220_v33 }
 0x364   : > { %2035 = vmatpush3.bf16.msra.mxu1 %v2253_v21 }
 0x365   : > { %2036 = vmatprep.subr.bf16.mxu1 %v2254_v22 }
 0x366   : > { %1249 = vmax.xlane.f32.xlu1 %v1248_v36 }
 0x367   : > { %1252 = vmax.xlane.f32.xlu0 %v1251_v37 }
 0x368   : > { %2037 = vmatpush3.bf16.msra.mxu1 %v2254_v22 }
 0x369   : > { %2038 = vmatprep.subr.bf16.mxu1 %v2255_v23 }
 0x36a   : > { %1255 = vmax.xlane.f32.xlu1 %v1254_v39 }
 0x36c   : > { %2039 = vmatpush3.bf16.msra.mxu1 %v2255_v23 }
 0x3e4   : > { %v1225_v40 = vpop.xlane.xlu0 %1224 }
 0x3e5   : > { %v1231_v41 = vsub.f32 %v1194_v14, %v1225_v40 }
 0x3e7   : > { %v1237_v42 = vmul.f32 1.442695, %v1231_v41  ;;  %v1247_v43 = vpop.xlane.xlu1 %1246 }
 0x3e8   : > { %v1257_v44 = vsub.f32 %v1241_v24, %v1247_v43  ;;  %v1219_v45 = vpop.xlane.xlu0 %1218  ;;  %v2256_v24 = vld [vmem:[#allocation15 + $0x18] sm:$0xff]  }
 0x3e9   : > { %2268 = vpow2.f32 %v1237_v42  ;;  %v1229_v46 = vsub.f32 %v1186_v18, %v1219_v45  ;;  %v2250_v18 = vld [vmem:[#allocation3 + $0x8] sm:$0xff]   ;;  %2040 = vmatprep.subr.bf16.mxu1 %v2256_v24 }
 0x3ea   : > { %v1261_v47 = vmul.f32 1.442695, %v1257_v44  ;;  %2024 = vmatprep.subr.bf16.mxu0 %v2250_v18  ;;  %2041 = vmatpush3.bf16.msra.mxu1 %v2256_v24 }
 0x3eb   : > { %v1233_v48 = vmul.f32 1.442695, %v1229_v46  ;;  %v1228_v49 = vpop.xlane.xlu1 %1227  ;;  %2025 = vmatpush3.bf16.msra.mxu0 %v2250_v18  ;;  %2042 = vmatprep.subr.bf16.mxu1 %v2257_v25 }
 0x3ec   : > { %v1232_v50 = vsub.f32 %v1197_v26, %v1228_v49  ;;  %v1222_v51 = vpop.xlane.xlu0 %1221  ;;  %2026 = vmatprep.subr.bf16.mxu0 %v2251_v19 }
 0x3ed   : > { %2270 = vpow2.f32 %v1233_v48  ;;  %v1230_v52 = vsub.f32 %v1189_v29, %v1222_v51 }
 0x3ee   : > { %v1239_v53 = vmul.f32 1.442695, %v1232_v50  ;;  %2272 = vpow2.f32 %v1261_v47  ;;  %2043 = vmatpush3.bf16.msra.mxu1 %v2257_v25 }
 0x3ef   : > { %v1235_v54 = vmul.f32 1.442695, %v1230_v52  ;;  %v1250_v55 = vpop.xlane.xlu1 %1249  ;;  %2027 = vmatpush3.bf16.msra.mxu0 %v2251_v19 }
 0x3f0   : > { %2274 = vpow2.f32 %v1239_v53  ;;  %v1258_v56 = vsub.f32 %v1242_v34, %v1250_v55  ;;  %v1253_v57 = vpop.xlane.xlu0 %1252 }
 0x3f1   : > { %v1259_v58 = vsub.f32 %v1243_v35, %v1253_v57  ;;  %2276 = vpow2.f32 %v1235_v54 }
 0x3f2   : > { %v1263_v59 = vmul.f32 1.442695, %v1258_v56 }
 0x3f3   : > { %v1265_v60 = vmul.f32 1.442695, %v1259_v58  ;;  %v1256_v61 = vpop.xlane.xlu1 %1255 }
 0x3f4   : > { %v1260_v62 = vsub.f32 %v1244_v38, %v1256_v61 }
 0x3f5   : > { %2278 = vpow2.f32 %v1265_v60 }
 0x3f6   : > { %v2984_v63 = vpop.eup %2268  ;;  %2280 = vpow2.f32 %v1263_v59  ;;  %v1267_v0 = vmul.f32 1.442695, %v1260_v62 }
 0x3f7   : > { %v1275_v1 = vsel %vm1216_vm0, %v2984_v63, 0.0 }
 0x3f8   : > { %1276 = vadd.xlane.f32.xlu0 %v1275_v1  ;;  %2282 = vpow2.f32 %v1267_v0  ;;  %v2258_v1 = vld [vmem:[#allocation15 + $0x8] sm:$0xff]  }
 0x3f9   : > { %2044 = vmatprep.subr.bf16.mxu1 %v2258_v1 }
 0x3fa   : > { %v2988_v2 = vpop.eup %2270  ;;  %2045 = vmatpush3.bf16.msra.mxu1 %v2258_v1 }
 0x3fb   : > { %v1269_v3 = vsel %vm1216_vm0, %v2988_v2, 0.0  ;;  %v2992_v4 = vpop.eup %2272 }
 0x3fc   : > { %1270 = vadd.xlane.f32.xlu0 %v1269_v3  ;;  %v1285_v8 = vsel %vm1216_vm0, %v2992_v4, 0.0 }
 0x3fd   : > { %v2994_v5 = vpop.eup %2274 }
 0x3fe   : > { %v1278_v6 = vsel %vm1216_vm0, %v2994_v5, 0.0  ;;  %v2998_v7 = vpop.eup %2276 }
 0x3ff   : > { %1279 = vadd.xlane.f32.xlu1 %v1278_v6  ;;  %v1272_v10 = vsel %vm1216_vm0, %v2998_v7, 0.0 }
 0x400   : > { %1286 = vadd.xlane.f32.xlu0 %v1285_v8  ;;  %v1806_v8 = vld [vmem:[%s3177_s17] ss:$0 sm:$0xff] }
 0x402   : > { %v3002_v9 = vpop.eup %2278 }
 0x403   : > { %v3006_v11 = vpop.eup %2280  ;;  %1273 = vadd.xlane.f32.xlu1 %v1272_v10  ;;  %v1291_v12 = vsel %vm1216_vm0, %v3002_v9, 0.0 }
 0x404   : > { %1292 = vadd.xlane.f32.xlu0 %v1291_v12  ;;  %v1288_v13 = vsel %vm1216_vm0, %v3006_v11, 0.0 }
 0x405   : > { %v3012_v14 = vpop.eup %2282 }
 0x406   : > { %v1294_v15 = vsel %vm1216_vm0, %v3012_v14, 0.0 }
 0x407   : > { %1289 = vadd.xlane.f32.xlu1 %v1288_v13 }
 0x40b   : > { %1295 = vadd.xlane.f32.xlu1 %v1294_v15 }
 0x481   : > { %v1277_v26 = vpop.xlane.xlu0 %1276 }
 0x485   : > { %v1271_v27 = vpop.xlane.xlu0 %1270 }
 0x488   : > { %v1280_v28 = vpop.xlane.xlu1 %1279 }
 0x489   : > { %v1287_v29 = vpop.xlane.xlu0 %1286 }
 0x48a   : > { %2284 = vrcp.f32 %v1287_v29 }
 0x48b   : > { %2286 = vrcp.f32 %v1271_v27 }
 0x48c   : > { %v1274_v30 = vpop.xlane.xlu1 %1273 }
 0x48d   : > { %2288 = vrcp.f32 %v1274_v30  ;;  %v1293_v31 = vpop.xlane.xlu0 %1292 }
 0x48e   : > { %2290 = vrcp.f32 %v1277_v26 }
 0x48f   : > { %2292 = vrcp.f32 %v1293_v31 }
 0x490   : > { %2294 = vrcp.f32 %v1280_v28  ;;  %v1290_v32 = vpop.xlane.xlu1 %1289 }
 0x491   : > { %2296 = vrcp.f32 %v1290_v32 }
 0x494   : > { %v1296_v33 = vpop.xlane.xlu1 %1295 }
 0x495   : > { %2298 = vrcp.f32 %v1296_v33 }
 0x497   : > { %v2285_v34 = vpop.eup %2284 }
 0x498   : > { %v2287_v35 = vpop.eup %2286  ;;  %v1309_v38 = vmul.f32 0.5, %v2285_v34 }
 0x499   : > { %v1301_v41 = vmul.f32 0.5, %v2287_v35 }
 0x49a   : > { %v2289_v36 = vpop.eup %2288  ;;  %v1313_v44 = vmul.f32 %v2992_v4, %v1309_v38 }
 0x49b   : > { %v2291_v37 = vpop.eup %2290  ;;  %v1302_v42 = vmul.f32 0.5, %v2289_v36  ;;  %v1305_v48 = vmul.f32 %v2988_v2, %v1301_v41  ;;  %v2259_v2 = vld [vmem:[#allocation15] sm:$0xff]  }
 0x49c   : > { %v2293_v39 = vpop.eup %2292  ;;  %v1303_v47 = vmul.f32 0.5, %v2291_v37  ;;  %2046 = vmatprep.subr.bf16.mxu1 %v2259_v2 }
 0x49d   : > { %v2295_v40 = vpop.eup %2294  ;;  %v1311_v45 = vmul.f32 0.5, %v2293_v39  ;;  %v1306_v50 = vmul.f32 %v2998_v7, %v1302_v42  ;;  %v1317_v53 = vadd.f32 %v1313_v44, %v1305_v48  ;;  %2047 = vmatpush3.bf16.msra.mxu1 %v2259_v2 }
 0x49e   : > { %v2297_v43 = vpop.eup %2296  ;;  %v1304_v49 = vmul.f32 0.5, %v2295_v40  ;;  %v1307_v57 = vmul.f32 %v2984_v63, %v1303_v47 }
 0x49f   : > { %v1310_v46 = vmul.f32 0.5, %v2297_v43  ;;  %v1315_v54 = vmul.f32 %v3002_v9, %v1311_v45 }
 0x4a0   : > { %v1308_v58 = vmul.f32 %v2994_v5, %v1304_v49 }
 0x4a1   : > { %v1314_v51 = vmul.f32 %v3006_v11, %v1310_v46  ;;  %v1319_v61 = vadd.f32 %v1315_v54, %v1307_v57 }
 0x4a2   : > { %v2299_v52 = vpop.eup %2298 }
 0x4a3   : > { %v1318_v55 = vadd.f32 %v1314_v51, %v1306_v50  ;;  %v1312_v56 = vmul.f32 0.5, %v2299_v52 }
 0x4a5   : > { %v1316_v59 = vmul.f32 %v3012_v14, %v1312_v56  ;;  %v1321_v60 = vpack.c.bf16 %v1318_v55, %v1317_v53 }
 0x4a7   : > { %v1320_v62 = vadd.f32 %v1316_v59, %v1308_v58  ;;  %2028 = vmatprep.mubr.msk.bf16.mxu0 %vm1216_vm0, %v1321_v60 }
 0x4a9   : > { %v1322_v0 = vpack.c.bf16 %v1320_v62, %v1319_v61 }
 0x4ab   : > { %2029 = vmatmul.mubr.msk.bf16.vlgmr.msra.gmra.mxu0 %vm1216_vm0, %v1322_v0 }
 0x56b   : > { %v2030_v63 = vpop.f32.mrf.mxu0 }
 0x56d   : > { %v1395_v3 = vpop.f32.mrf.mxu0 }
 0x56f   : > { %v2031_v4 = vpop.f32.mrf.mxu0 }
 0x570   : > { %v1411_v7 = vpack.c.bf16 %v2031_v4, %v2030_v63 }
 0x571   : > { %v1398_v5 = vpop.f32.mrf.mxu0 }
 0x572   : > { %v1410_v6 = vpack.c.bf16 %v1398_v5, %v1395_v3 }
 0x574   : > { %2048 = vmatprep.mubr.bf16.mxu1 %v1410_v6 }
 0x575   : > { %2049 = vmatmul.mubr.bf16.vlgmr.msra.gmra.mxu1 %v1411_v7 }
 0x635   : > { %v2050_v9 = vpop.f32.mrf.mxu1 }
 0x636   : > { %v1526_v10 = vadd.f32 %v2050_v9, %v1806_v8 }
 0x637   : > { %v1517_v11 = vpop.f32.mrf.mxu1 }
 0x638   : > { %1534 = vst [vmem:[%s2952_s3 + $0x10] sm:$0xff] %v1526_v10  ;;  %v1518_v12 = vadd.f32 %v1806_v8, %v1517_v11 }
 0x639   : > { %v2051_v13 = vpop.f32.mrf.mxu1 }
 0x63a   : > { %1532 = vst [vmem:[%s2952_s3] sm:$0xff] %v1518_v12  ;;  %v1529_v14 = vadd.f32 %v2051_v13, %v1806_v8 }
 0x63b   : > { %v1520_v15 = vpop.f32.mrf.mxu1 }
 0x63c   : > { %1535 = vst [vmem:[%s2952_s3 + $0x18] sm:$0xff] %v1529_v14  ;;  %v1521_v16 = vadd.f32 %v1806_v8, %v1520_v15 }
 0x63e   : > { %1533 = vst [vmem:[%s2952_s3 + $0x8] sm:$0xff] %v1521_v16 }
 0x63f   : > { %2484 = shalt.err (!%p2481_p3)
}
 0x640   : > { %s2485_s3 = scalar_lea.hbm %s3037_s0, 512  ;;  %s2489_s8 = scalar_lea.hbm %s3178_s29, 2048 }
 0x641   : > { %p2486_p12 = scmp.ne.s32.totalorder %s3037_s0, %s2485_s3  ;;  %p2490_p10 = scmp.lt.s32.totalorder %s3037_s0, %s3178_s29 }
 0x642   : > { %p2491_p6 = scmp.lt.s32.totalorder %s2489_s8, %s2485_s3 }
 0x643   : > { %p2487_p11 = pnand %p2486_p12, %p3179_p4 }
 0x644   : > { %p2492_p9 = por %p2491_p6, %p2490_p10 }
 0x645   : > { %p2488_p2 = pneg %p2487_p11 }
 0x647   : > { %p2493_p1 = pnand %p2492_p9, %p2488_p2 }
 0x649   : > { %2496 = shalt.err (!%p2493_p1)
}
 0x64a   : > { %s2623_s11 = smov 128   ;;  %s2624_s7 = smov 8  }
 0x64b   : > { %2076 = dma.vmem_to_hbm [thread:$0]  (%p3179_p4), %s3039_s15, 512, %s3037_s0, %s1537_s12, %s2623_s11, %s2623_s11, %s2624_s7  }
 0x64c PF: > { %s3180_s16 = sld [smem:[#allocation25_spill]]  ;;  %p2116_p7 = scmp.ge.s32.totalorder %s2611_s27, 2 }
 0x64d   : > { %s3181_s23 = sld [smem:[#allocation30_spill]] }
 0x652   : > { %s1567_s5 = sand.u32 1, %s3180_s16  }
 0x653   : > { %p3182_p13 = scmp.ne.s32.totalorder %s3181_s23, 0  ;;  %s1568_s20 = scalar_lea.sflag [#allocation6], %s1567_s5 }
 0x655   : > { %p2102_p8 = pnand %p2116_p7, %p3182_p13 }
 0x657   : > { %p2103_p5 = pneg %p2102_p8 }
 0x659   : > { %2566 = dma.done.wait (%p2103_p5), %s1568_s20, 512  }
 0x65a   : > { %2568 = vsyncadd (%p2103_p5), %s1568_s20, 4294966784  ;;  %s33_s27 = sadd.s32 1, %s2611_s27   ;;  %s3183_s4 = sld [smem:[#allocation28_spill]] }
 0x65b   : > { %p30_p0 = scmp.ge.s32.totalorder %s33_s27, 6   ;;  %s3184_s6 = sld [smem:[#allocation29_spill]] }
 0x65c   : > { %s3185_s17 = smov %s2575_s18  ;;  %s3186_s18 = smov %s2579_s19 }
 0x65d   : > { %s3187_s19 = smov %s2881_s10  ;;  %s3188_s20 = smov %s2587_s21 }
 0x65e   : > { %s3189_s21 = smov %s2591_s22  ;;  %s3190_s22 = smov %s2856_s28 }
 0x65f   : > { %s3191_s23 = smov %s2603_s25  ;;  %s3192_s24 = smov %s2607_s26 }
 0x660   : > { %s3193_s25 = smov %s3183_s4  ;;  %32 = sbr.rel (!%p30_p0) target bundleno = 25 (0x19), region = 147 }
 0x661   : > { %s3194_s26 = smov %s3184_s6 }
 0x665   :  { %1573 = vsyncpa [#allocation5], 1 }
 0x666   :  { %1575 = vsyncpa [#allocation5 + $0x1], 1 }
 0x667   :  { %1576 = vsyncpa [#allocation10], 1 }
 0x668   :  { %1578 = vsyncpa [#allocation10 + $0x1], 1 }
 0x669   :  { %1579 = vsyncpa [#allocation13], 1 }
 0x66a   :  { %1580 = vsyncpa [#allocation16], 1 }
 0x66b   :  { %1581 = vsyncpa [#allocation6], 1 }
 0x66c   :  { %1583 = vsyncpa [#allocation6 + $0x1], 1 }
 0x66d   :  { %1584 = vsyncpa [#allocation7], 1 }
 0x66e   :  { %1586 = vsyncpa [#allocation7 + $0x1], 1 }

</bundles_post_ra>
